<compile_context>
chip_gen: v5e
topology: v5e:2x2
jax: 0.10.0
libtpu: 0.0.40
codegen_flags: <defaults>
</compile_context>

<pallas_src>
import jax
import jax.numpy as jnp
from jax.experimental import pallas as pl
from jax.experimental.pallas import tpu as pltpu


def _make_kernel(num_layers, n_nodes, half_cols):
    """Kernel for one tile of INST_TILE (batch, window) instances.

    The Python loop over GCN layers is unrolled at trace time; all instances
    of the tile ride along in the lane-dense column dimension, so each layer
    is exactly two MXU matmuls plus one f32 GLU elementwise pass.
    """

    def kernel(h_ref, adj_ref, *rest):
        param_refs = rest[:-1]               # 2 refs per layer: fused W, fused b
        out_ref = rest[-1]

        adj = adj_ref[...]                   # (3N, 3N)             bf16
        h = h_ref[0]                         # (3N, TILE*C_in)      bf16

        acc = None
        for l in range(num_layers):
            fw = param_refs[2 * l + 0][...]  # (TILE*C_l, 2*TILE*F) bf16
            fb = param_refs[2 * l + 1][...]  # (1, 2*TILE*F)        f32

            # Graph aggregation for all instances at once (MXU, f32 accum).
            g = jnp.dot(adj, h, preferred_element_type=jnp.float32)
            gb = g.astype(jnp.bfloat16)
            # Fused GLU linear: one matmul yields [lhs | rhs]; the split at
            # half_cols (= TILE*F, a multiple of 128 here) is vreg-aligned.
            z = jnp.dot(gb, fw, preferred_element_type=jnp.float32) + fb
            zl = z[:, :half_cols]
            zr = z[:, half_cols:]
            hf = zl * jax.nn.sigmoid(zr)     # (3N, TILE*F) f32

            mid = hf[n_nodes:2 * n_nodes, :]  # middle time-step's nodes
            acc = mid if acc is None else jnp.maximum(acc, mid)

            if l + 1 < num_layers:
                h = hf.astype(jnp.bfloat16)  # next layer's MXU input

        out_ref[0] = acc.astype(out_ref.dtype)   # (N, TILE*F) lane-dense store

    return kernel


def stsgcl_individual_pallas(data, adj, temporal_emb, spatial_emb,
                             weights, biases):
    """STSGCL forward, module_type='individual' (tied window weights), GLU.

    data:         (B, T, N, C) float32
    adj:          (3N, 3N)     float32
    temporal_emb: (1, T, 1, C)
    spatial_emb:  (1, 1, N, C)
    weights[l]:   (C_l, 2F)    with C_0 = C, C_l = F for l > 0
    biases[l]:    (2F,)
    returns:      (B, T-2, N, F)
    """
    B, T, N, C = data.shape
    L = len(weights)
    F = weights[0].shape[1] // 2
    W = T - 2
    NI = B * W                       # independent (batch, window) instances

    # --- instance tile: ~256 packed feature columns per grid step, but keep
    # --- at least two grid steps when possible (v7x has 2 TensorCores).
    tile = max(1, 256 // C)
    while tile > 1 and -(-NI // tile) < 2:
        tile = -(-tile // 2)
    n_tiles = -(-NI // tile)
    ni_pad = n_tiles * tile

    # --- glue: position embeddings + window packing (fused by XLA) ----------
    x = data + temporal_emb + spatial_emb
    # H[t, s*N + n, j*C + c] = x[b, w + s, n, c]   with  t*tile + j = b*W + w.
    # TODO(synk): for large T/N move this packing in-kernel (feed (B, N, T*C)
    # and assemble the 3 node blocks with pl.ds slices) to avoid the ~2.25x
    # HBM duplication; negligible at these sizes.
    win = jnp.stack([x[:, s:s + W] for s in range(3)], axis=2)   # (B,W,3,N,C)
    win = win.reshape(NI, 3 * N, C)
    win = jnp.pad(win, ((0, ni_pad - NI), (0, 0), (0, 0)))       # pad instances
    h_all = (win.reshape(n_tiles, tile, 3 * N, C)
                .transpose(0, 2, 1, 3)
                .reshape(n_tiles, 3 * N, tile * C)
                .astype(jnp.bfloat16))

    adj_bf = adj.astype(jnp.bfloat16)

    in_specs = [
        pl.BlockSpec((1, 3 * N, tile * C), lambda t: (t, 0, 0)),  # per-tile h
        pl.BlockSpec((3 * N, 3 * N), lambda t: (0, 0)),           # adj (invariant)
    ]
    flat_params = []
    eye = jnp.eye(tile, dtype=jnp.float32)
    for w, bias in zip(weights, biases):
        cin = w.shape[0]
        # Block-diagonal GLU weights over the *instance tile* only (size is
        # bounded by TILE, independent of T-2 and B), with both GLU halves
        # fused into one MXU RHS whose split is 128-lane aligned.
        fw = jnp.concatenate(
            [jnp.kron(eye, w[:, :F]), jnp.kron(eye, w[:, F:])],
            axis=1).astype(jnp.bfloat16)                  # (tile*cin, 2*tile*F)
        fb = jnp.concatenate(
            [jnp.tile(bias[:F], tile), jnp.tile(bias[F:], tile)]
        ).reshape(1, 2 * tile * F)                        # f32
        flat_params += [fw, fb]
        in_specs += [
            pl.BlockSpec((tile * cin, 2 * tile * F), lambda t: (0, 0)),
            pl.BlockSpec((1, 2 * tile * F), lambda t: (0, 0)),
        ]

    # --- explicit VMEM budget (matters on v7x once N / T / F are scaled) ----
    bytes_params = sum(int(p.size) * p.dtype.itemsize for p in flat_params)
    est = (2 * (3 * N) * (tile * C) * 2              # double-buffered h block
           + 2 * N * (tile * F) * 4                  # double-buffered out block
           + 2 * (bytes_params + int(adj_bf.size) * 2)   # invariant operands
           + 4 * (3 * N) * (2 * tile * F) * 4)       # f32 working set
    vmem_limit = int(min(max(2 * est, 32 * 1024 * 1024), 64 * 1024 * 1024))

    out_flat = pl.pallas_call(
        _make_kernel(L, N, tile * F),
        out_shape=jax.ShapeDtypeStruct((n_tiles, N, tile * F), jnp.float32),
        grid_spec=pltpu.PrefetchScalarGridSpec(
            num_scalar_prefetch=0,
            grid=(n_tiles,),
            in_specs=in_specs,
            out_specs=pl.BlockSpec((1, N, tile * F), lambda t: (t, 0, 0)),
        ),
        compiler_params=pltpu.CompilerParams(
            dimension_semantics=("parallel",),
            vmem_limit_bytes=vmem_limit),
    )(h_all, adj_bf, *flat_params)

    # (n_tiles, N, tile*F) -> (B, W, N, F) = (B, T-2, N, F)
    out = (out_flat.reshape(n_tiles, N, tile, F)
                   .transpose(0, 2, 1, 3)
                   .reshape(ni_pad, N, F)[:NI]
                   .reshape(B, W, N, F))
    return out


def stsgcl_individual_ref(data, adj, temporal_emb, spatial_emb,
                          weights, biases):
    """Pure-JAX (f32) reference mirroring the PyTorch forward."""
    B, T, N, C = data.shape
    F = weights[0].shape[1] // 2
    x = data + temporal_emb + spatial_emb
    outs = []
    for i in range(T - 2):
        t = x[:, i:i + 3].reshape(B, 3 * N, C)        # (B, 3N, C)
        h = t
        need_concat = []
        for w, bias in zip(weights, biases):
            h = jnp.matmul(adj, h)                    # (B, 3N, C_l)
            z = jnp.matmul(h, w) + bias               # (B, 3N, 2F)
            lhs, rhs = z[..., :F], z[..., F:]
            h = lhs * jax.nn.sigmoid(rhs)             # (B, 3N, F)
            need_concat.append(jnp.transpose(h, (1, 0, 2)))   # (3N, B, F)
        cropped = [c[N:2 * N][None] for c in need_concat]     # (1, N, B, F)
        m = jnp.max(jnp.concatenate(cropped, axis=0), axis=0)  # (N, B, F)
        outs.append(jnp.transpose(m, (1, 0, 2))[:, None])      # (B, 1, N, F)
    return jnp.concatenate(outs, axis=1)              # (B, T-2, N, F)


if __name__ == "__main__":
    # Small deterministic shapes consistent with the module.
    B, T, N, C = 2, 8, 16, 32          # batch, input_length, vertices, feats
    F = 32                             # filters = [F, F, F] (GLU)
    filters = [F, F, F]

    key = jax.random.PRNGKey(0)
    keys = jax.random.split(key, 4 + 2 * len(filters))

    data = jax.random.normal(keys[0], (B, T, N, C), dtype=jnp.float32)
    adj = jax.random.uniform(keys[1], (3 * N, 3 * N), dtype=jnp.float32) / (3 * N)
    temporal_emb = 0.1 * jax.random.normal(keys[2], (1, T, 1, C), jnp.float32)
    spatial_emb = 0.1 * jax.random.normal(keys[3], (1, 1, N, C), jnp.float32)

    weights, biases = [], []
    cin = C
    for l, f in enumerate(filters):
        kw, kb = keys[4 + 2 * l], keys[5 + 2 * l]
        bound = 1.0 / jnp.sqrt(cin)     # torch nn.Linear default init bound
        weights.append(jax.random.uniform(kw, (cin, 2 * f), jnp.float32,
                                          minval=-bound, maxval=bound))
        biases.append(jax.random.uniform(kb, (2 * f,), jnp.float32,
                                         minval=-bound, maxval=bound))
        cin = f

    fwd = jax.jit(stsgcl_individual_pallas)
    out = fwd(data, adj, temporal_emb, spatial_emb, weights, biases)
    out = jax.block_until_ready(out)

    ref = stsgcl_individual_ref(data, adj, temporal_emb, spatial_emb,
                                weights, biases)
    ref = jax.block_until_ready(ref)

    assert out.shape == (B, T - 2, N, F), out.shape
    # bf16 matmul inputs (f32 accumulation) vs. pure-f32 reference.
    assert jnp.allclose(out, ref, rtol=2e-2, atol=2e-2), (
        float(jnp.max(jnp.abs(out - ref))))

    print("KERNEL_OK")
</pallas_src>

<mosaic_0001>
module attributes {stable_mosaic.version = 11 : i64} {
  func.func @kernel(%arg0: i32, %arg1: memref<1x48x256xbf16, #tpu.memory_space<vmem>>, %arg2: memref<48x48xbf16, #tpu.memory_space<vmem>>, %arg3: memref<256x512xbf16, #tpu.memory_space<vmem>>, %arg4: memref<1x512xf32, #tpu.memory_space<vmem>>, %arg5: memref<256x512xbf16, #tpu.memory_space<vmem>>, %arg6: memref<1x512xf32, #tpu.memory_space<vmem>>, %arg7: memref<256x512xbf16, #tpu.memory_space<vmem>>, %arg8: memref<1x512xf32, #tpu.memory_space<vmem>>, %arg9: memref<1x16x256xf32, #tpu.memory_space<vmem>>) attributes {dimension_semantics = [#tpu.dimension_semantics<parallel>], iteration_bounds = array<i64: 2>, scalar_prefetch = 0 : i64, scratch_operands = 0 : i64, tpu.core_type = #tpu.core_type<tc>, window_params = [{transform_indices = @transform_0, window_bounds = array<i64: 1, 48, 256>}, {pipeline_mode = #tpu.pipeline_mode<synchronous>, transform_indices = @transform_1, window_bounds = array<i64: 48, 48>}, {pipeline_mode = #tpu.pipeline_mode<synchronous>, transform_indices = @transform_2, window_bounds = array<i64: 256, 512>}, {pipeline_mode = #tpu.pipeline_mode<synchronous>, transform_indices = @transform_3, window_bounds = array<i64: 1, 512>}, {pipeline_mode = #tpu.pipeline_mode<synchronous>, transform_indices = @transform_4, window_bounds = array<i64: 256, 512>}, {pipeline_mode = #tpu.pipeline_mode<synchronous>, transform_indices = @transform_5, window_bounds = array<i64: 1, 512>}, {pipeline_mode = #tpu.pipeline_mode<synchronous>, transform_indices = @transform_6, window_bounds = array<i64: 256, 512>}, {pipeline_mode = #tpu.pipeline_mode<synchronous>, transform_indices = @transform_7, window_bounds = array<i64: 1, 512>}, {transform_indices = @transform_8, window_bounds = array<i64: 1, 16, 256>}]} {
    %c0 = arith.constant 0 : index
    %c0_0 = arith.constant 0 : index
    %0 = vector.load %arg2[%c0, %c0_0] : memref<48x48xbf16, #tpu.memory_space<vmem>>, vector<48x48xbf16>
    %c0_1 = arith.constant 0 : index
    %c0_2 = arith.constant 0 : index
    %c0_3 = arith.constant 0 : index
    %1 = vector.load %arg1[%c0_1, %c0_2, %c0_3] : memref<1x48x256xbf16, #tpu.memory_space<vmem>>, vector<1x48x256xbf16>
    %2 = vector.shape_cast %1 : vector<1x48x256xbf16> to vector<48x256xbf16>
    %c0_4 = arith.constant 0 : index
    %c0_5 = arith.constant 0 : index
    %3 = vector.load %arg3[%c0_4, %c0_5] : memref<256x512xbf16, #tpu.memory_space<vmem>>, vector<256x512xbf16>
    %c0_6 = arith.constant 0 : index
    %c0_7 = arith.constant 0 : index
    %4 = vector.load %arg4[%c0_6, %c0_7] : memref<1x512xf32, #tpu.memory_space<vmem>>, vector<1x512xf32>
    %cst = arith.constant dense<0.000000e+00> : vector<48x256xf32>
    %5 = tpu.matmul %0, %2, %cst {dimension_numbers = #tpu.dot_dimension_numbers<[1], [0], [0], [1], [0, 0, 1, 1], [], []>} : vector<48x48xbf16>, vector<48x256xbf16>, vector<48x256xf32> -> vector<48x256xf32>
    %6 = arith.truncf %5 : vector<48x256xf32> to vector<48x256xbf16>
    %cst_8 = arith.constant dense<0.000000e+00> : vector<48x512xf32>
    %7 = tpu.matmul %6, %3, %cst_8 {dimension_numbers = #tpu.dot_dimension_numbers<[1], [0], [0], [1], [0, 0, 1, 1], [], []>} : vector<48x256xbf16>, vector<256x512xbf16>, vector<48x512xf32> -> vector<48x512xf32>
    %8 = vector.broadcast %4 : vector<1x512xf32> to vector<48x512xf32>
    %9 = arith.addf %7, %8 : vector<48x512xf32>
    %10 = vector.extract_strided_slice %9 {offsets = [0, 0], sizes = [48, 256], strides = [1, 1]} : vector<48x512xf32> to vector<48x256xf32>
    %11 = vector.extract_strided_slice %9 {offsets = [0, 256], sizes = [48, 256], strides = [1, 1]} : vector<48x512xf32> to vector<48x256xf32>
    %12 = arith.negf %11 : vector<48x256xf32>
    %13 = math.exp %12 : vector<48x256xf32>
    %cst_9 = arith.constant 1.000000e+00 : f32
    %14 = vector.broadcast %cst_9 : f32 to vector<48x256xf32>
    %15 = arith.addf %14, %13 : vector<48x256xf32>
    %16 = arith.divf %14, %15 : vector<48x256xf32>
    %17 = arith.mulf %10, %16 : vector<48x256xf32>
    %18 = vector.extract_strided_slice %17 {offsets = [16, 0], sizes = [16, 256], strides = [1, 1]} : vector<48x256xf32> to vector<16x256xf32>
    %19 = arith.truncf %17 : vector<48x256xf32> to vector<48x256xbf16>
    %c0_10 = arith.constant 0 : index
    %c0_11 = arith.constant 0 : index
    %20 = vector.load %arg5[%c0_10, %c0_11] : memref<256x512xbf16, #tpu.memory_space<vmem>>, vector<256x512xbf16>
    %c0_12 = arith.constant 0 : index
    %c0_13 = arith.constant 0 : index
    %21 = vector.load %arg6[%c0_12, %c0_13] : memref<1x512xf32, #tpu.memory_space<vmem>>, vector<1x512xf32>
    %cst_14 = arith.constant dense<0.000000e+00> : vector<48x256xf32>
    %22 = tpu.matmul %0, %19, %cst_14 {dimension_numbers = #tpu.dot_dimension_numbers<[1], [0], [0], [1], [0, 0, 1, 1], [], []>} : vector<48x48xbf16>, vector<48x256xbf16>, vector<48x256xf32> -> vector<48x256xf32>
    %23 = arith.truncf %22 : vector<48x256xf32> to vector<48x256xbf16>
    %cst_15 = arith.constant dense<0.000000e+00> : vector<48x512xf32>
    %24 = tpu.matmul %23, %20, %cst_15 {dimension_numbers = #tpu.dot_dimension_numbers<[1], [0], [0], [1], [0, 0, 1, 1], [], []>} : vector<48x256xbf16>, vector<256x512xbf16>, vector<48x512xf32> -> vector<48x512xf32>
    %25 = vector.broadcast %21 : vector<1x512xf32> to vector<48x512xf32>
    %26 = arith.addf %24, %25 : vector<48x512xf32>
    %27 = vector.extract_strided_slice %26 {offsets = [0, 0], sizes = [48, 256], strides = [1, 1]} : vector<48x512xf32> to vector<48x256xf32>
    %28 = vector.extract_strided_slice %26 {offsets = [0, 256], sizes = [48, 256], strides = [1, 1]} : vector<48x512xf32> to vector<48x256xf32>
    %29 = arith.negf %28 : vector<48x256xf32>
    %30 = math.exp %29 : vector<48x256xf32>
    %cst_16 = arith.constant 1.000000e+00 : f32
    %31 = vector.broadcast %cst_16 : f32 to vector<48x256xf32>
    %32 = arith.addf %31, %30 : vector<48x256xf32>
    %33 = arith.divf %31, %32 : vector<48x256xf32>
    %34 = arith.mulf %27, %33 : vector<48x256xf32>
    %35 = vector.extract_strided_slice %34 {offsets = [16, 0], sizes = [16, 256], strides = [1, 1]} : vector<48x256xf32> to vector<16x256xf32>
    %36 = arith.maximumf %18, %35 : vector<16x256xf32>
    %37 = arith.truncf %34 : vector<48x256xf32> to vector<48x256xbf16>
    %c0_17 = arith.constant 0 : index
    %c0_18 = arith.constant 0 : index
    %38 = vector.load %arg7[%c0_17, %c0_18] : memref<256x512xbf16, #tpu.memory_space<vmem>>, vector<256x512xbf16>
    %c0_19 = arith.constant 0 : index
    %c0_20 = arith.constant 0 : index
    %39 = vector.load %arg8[%c0_19, %c0_20] : memref<1x512xf32, #tpu.memory_space<vmem>>, vector<1x512xf32>
    %cst_21 = arith.constant dense<0.000000e+00> : vector<48x256xf32>
    %40 = tpu.matmul %0, %37, %cst_21 {dimension_numbers = #tpu.dot_dimension_numbers<[1], [0], [0], [1], [0, 0, 1, 1], [], []>} : vector<48x48xbf16>, vector<48x256xbf16>, vector<48x256xf32> -> vector<48x256xf32>
    %41 = arith.truncf %40 : vector<48x256xf32> to vector<48x256xbf16>
    %cst_22 = arith.constant dense<0.000000e+00> : vector<48x512xf32>
    %42 = tpu.matmul %41, %38, %cst_22 {dimension_numbers = #tpu.dot_dimension_numbers<[1], [0], [0], [1], [0, 0, 1, 1], [], []>} : vector<48x256xbf16>, vector<256x512xbf16>, vector<48x512xf32> -> vector<48x512xf32>
    %43 = vector.broadcast %39 : vector<1x512xf32> to vector<48x512xf32>
    %44 = arith.addf %42, %43 : vector<48x512xf32>
    %45 = vector.extract_strided_slice %44 {offsets = [0, 0], sizes = [48, 256], strides = [1, 1]} : vector<48x512xf32> to vector<48x256xf32>
    %46 = vector.extract_strided_slice %44 {offsets = [0, 256], sizes = [48, 256], strides = [1, 1]} : vector<48x512xf32> to vector<48x256xf32>
    %47 = arith.negf %46 : vector<48x256xf32>
    %48 = math.exp %47 : vector<48x256xf32>
    %cst_23 = arith.constant 1.000000e+00 : f32
    %49 = vector.broadcast %cst_23 : f32 to vector<48x256xf32>
    %50 = arith.addf %49, %48 : vector<48x256xf32>
    %51 = arith.divf %49, %50 : vector<48x256xf32>
    %52 = arith.mulf %45, %51 : vector<48x256xf32>
    %53 = vector.extract_strided_slice %52 {offsets = [16, 0], sizes = [16, 256], strides = [1, 1]} : vector<48x256xf32> to vector<16x256xf32>
    %54 = arith.maximumf %36, %53 : vector<16x256xf32>
    %c0_24 = arith.constant 0 : index
    %c0_25 = arith.constant 0 : index
    %c0_26 = arith.constant 0 : index
    %55 = vector.load %arg9[%c0_24, %c0_25, %c0_26] : memref<1x16x256xf32, #tpu.memory_space<vmem>>, vector<1x16x256xf32>
    %56 = vector.shape_cast %55 : vector<1x16x256xf32> to vector<16x256xf32>
    %57 = vector.shape_cast %54 : vector<16x256xf32> to vector<1x16x256xf32>
    tpu.vector_store %arg9[%c0_24, %c0_25, %c0_26], %57 {strides = array<i32>} : memref<1x16x256xf32, #tpu.memory_space<vmem>>, vector<1x16x256xf32>,
    return
  }
  func.func @transform_0(%arg0: i32) -> (i32, i32, i32) {
    %c0_i32 = arith.constant 0 : i32
    %c0_i32_0 = arith.constant 0 : i32
    %c0_i32_1 = arith.constant 0 : i32
    return %arg0, %c0_i32, %c0_i32_0 : i32, i32, i32
  }
  func.func @transform_1(%arg0: i32) -> (i32, i32) {
    %c0_i32 = arith.constant 0 : i32
    %c0_i32_0 = arith.constant 0 : i32
    %c0_i32_1 = arith.constant 0 : i32
    return %c0_i32, %c0_i32_0 : i32, i32
  }
  func.func @transform_2(%arg0: i32) -> (i32, i32) {
    %c0_i32 = arith.constant 0 : i32
    %c0_i32_0 = arith.constant 0 : i32
    %c0_i32_1 = arith.constant 0 : i32
    return %c0_i32, %c0_i32_0 : i32, i32
  }
  func.func @transform_3(%arg0: i32) -> (i32, i32) {
    %c0_i32 = arith.constant 0 : i32
    %c0_i32_0 = arith.constant 0 : i32
    %c0_i32_1 = arith.constant 0 : i32
    return %c0_i32, %c0_i32_0 : i32, i32
  }
  func.func @transform_4(%arg0: i32) -> (i32, i32) {
    %c0_i32 = arith.constant 0 : i32
    %c0_i32_0 = arith.constant 0 : i32
    %c0_i32_1 = arith.constant 0 : i32
    return %c0_i32, %c0_i32_0 : i32, i32
  }
  func.func @transform_5(%arg0: i32) -> (i32, i32) {
    %c0_i32 = arith.constant 0 : i32
    %c0_i32_0 = arith.constant 0 : i32
    %c0_i32_1 = arith.constant 0 : i32
    return %c0_i32, %c0_i32_0 : i32, i32
  }
  func.func @transform_6(%arg0: i32) -> (i32, i32) {
    %c0_i32 = arith.constant 0 : i32
    %c0_i32_0 = arith.constant 0 : i32
    %c0_i32_1 = arith.constant 0 : i32
    return %c0_i32, %c0_i32_0 : i32, i32
  }
  func.func @transform_7(%arg0: i32) -> (i32, i32) {
    %c0_i32 = arith.constant 0 : i32
    %c0_i32_0 = arith.constant 0 : i32
    %c0_i32_1 = arith.constant 0 : i32
    return %c0_i32, %c0_i32_0 : i32, i32
  }
  func.func @transform_8(%arg0: i32) -> (i32, i32, i32) {
    %c0_i32 = arith.constant 0 : i32
    %c0_i32_0 = arith.constant 0 : i32
    %c0_i32_1 = arith.constant 0 : i32
    return %arg0, %c0_i32, %c0_i32_0 : i32, i32, i32
  }
}

</mosaic_0001>

<bundles_post_ra>
// kernel: tile.43
= control target key start
LH: loop header
LB: loop body
LE: loop exit
PB: predicated region body
PF: predicated region fallthrough
CT: control target
= control target key end

     0   :  { %s22_s0 = inlined_call_operand.vmem [shape: f32[32], index: 0, kind: input, shape index: {}]   ;;  %s23_s1 = inlined_call_operand.vmem [shape: f32[8,32], index: 1, kind: output, shape index: {}]  }
   0x1   :  { %v4_v0 = vld [vmem:[%s22_s0] ss:$0 sm:$0xff] }
   0x2   :  { %5 = vst [vmem:[%s23_s1] sm:$0xff] %v4_v0 }

// kernel: tile.44
= control target key start
LH: loop header
LB: loop body
LE: loop exit
PB: predicated region body
PF: predicated region fallthrough
CT: control target
= control target key end

     0   :  { %s7_s6 = smov 3  ;;  %s39_s9 = smov 96   ;;  %vm4_vm0 = vcmask 261120   ;;  %vm11_vm1 = vcmask 1048320   ;;  %vm18_vm2 = vcmask 785920   ;;  %vm25_vm3 = vcmask 523520   ;;  %s67_s0 = inlined_call_operand.vmem [shape: f32[8,32], index: 0, kind: input, shape index: {}]   ;;  %s68_s1 = inlined_call_operand.vmem [shape: f32[256], index: 1, kind: output, shape index: {}]  }
   0x1   :  { %v33_v0 = vld [vmem:[%s67_s0 + $0x3] ss:$4 sm:%s7_s6]   ;;  %s21_s10 = smov 3  ;;  %s14_s13 = smov 3 }
   0x2   :  { %9 = vrot.lane.b32.xlu0 %v33_v0, %s39_s9  ;;  %v35_v1 = vld [vmem:[%s67_s0 + $0x1] ss:$4 sm:%s21_s10]   ;;  %s40_s14 = smov 32   ;;  %s41_s17 = smov 64  }
   0x3   :  { %23 = vrot.lane.b32.xlu1 %v35_v1, %s40_s14  ;;  %v34_v2 = vld [vmem:[%s67_s0 + $0x2] ss:$4 sm:%s14_s13]   ;;  %s2_s18 = smov 3 }
   0x4   :  { %v3_v3 = vld [vmem:[%s67_s0] ss:$4 sm:%s2_s18]  }
   0x5   :  { %5 = vst.msk [vmem:[#allocation0] sm:$0x3] %vm4_vm0, %v3_v3  }
   0xa   :  { %16 = vrot.lane.b32.xlu0 %v34_v2, %s41_s17 }
  0x74   :  { %v10_v4 = vpop.permute.xlu0 %9  }
  0x75   :  { %12 = vst.msk [vmem:[#allocation0] sm:$0x3] %vm11_vm1, %v10_v4   ;;  %v24_v5 = vpop.permute.xlu1 %23  }
  0x7c   :  { %v17_v6 = vpop.permute.xlu0 %16  }
  0x7d   :  { %19 = vst.msk [vmem:[#allocation0] sm:$0x3] %vm18_vm2, %v17_v6  }
  0x7e   :  { %26 = vst.msk [vmem:[#allocation0] sm:$0x3] %vm25_vm3, %v24_v5  }
  0x85   :  { %v29_v7 = vld [vmem:[#allocation0] sm:$0x3] }
  0x86   :  { %32 = vst [vmem:[%s68_s1] sm:$0x3] %v29_v7 }

// kernel: stsgcl_individual_pallas.1
= control target key start
LH: loop header
LB: loop body
LE: loop exit
PB: predicated region body
PF: predicated region fallthrough
CT: control target
= control target key end

     0   :  { %s4149_s27 = smov 0   ;;  %s6306_s0 = inlined_call_operand.vmem [shape: bf16[2,48,256], index: 0, kind: input, shape index: {}]   ;;  %s6307_s1 = inlined_call_operand.vmem [shape: bf16[48,48], index: 1, kind: input, shape index: {}]   ;;  %s6308_s2 = inlined_call_operand.vmem [shape: bf16[256,512], index: 2, kind: input, shape index: {}]   ;;  %s6309_s3 = inlined_call_operand.vmem [shape: f32[1,512], index: 3, kind: input, shape index: {}]   ;;  %s6310_s4 = inlined_call_operand.vmem [shape: bf16[256,512], index: 4, kind: input, shape index: {}]   ;;  %s6311_s5 = inlined_call_operand.vmem [shape: f32[1,512], index: 5, kind: input, shape index: {}]   ;;  %s6312_s6 = inlined_call_operand.vmem [shape: bf16[256,512], index: 6, kind: input, shape index: {}]   ;;  %s6313_s7 = inlined_call_operand.vmem [shape: f32[1,512], index: 7, kind: input, shape index: {}]   ;;  %s6314_s8 = inlined_call_operand.vmem [shape: f32[2,16,256], index: 8, kind: output, shape index: {}]  }
   0x1 LB: > { %s2901_s28 = sadd.s32 4294967295, %s4102_s27   ;;  %p2905_p0 = scmp.ge.s32.totalorder %s4102_s27, 1  ;;  %s4102_s27 = sphi %s4149_s27, %s18_s27  }
   0x2   : > { %p262_p1 = scmp.lt.s32.totalorder %s4102_s27, 3 }
   0x4   : > { %p263_p2 = pnand %p2905_p0, %p262_p1 }
   0x5   : > { %p296_p3 = scmp.lt.s32.totalorder (!%p263_p2), %s2901_s28, 1 }
   0x6   : > { %266 = sbr.rel (%p263_p2) target bundleno = 1216 (0x4c0), region = 52 }
   0xb   : > { %s6396_s28 = smov (!%p296_p3, %s2901_s28), 1  ;;  %v3065_v16 = vld [vmem:[%s6308_s2 + $0xe0] sm:$0xf]  ;;  %v3801_v17 = vld [vmem:[%s6308_s2 + $0xec] sm:$0xf0]  ;;  %vm6315_vm0 = vcmask 392192  }
   0xc   : > { %s3969_s29 = smul.u32 48, %s6396_s28  ;;  %v3193_v18 = vld [vmem:[%s6308_s2 + $0x1e0] sm:$0xf]  ;;  %v3833_v19 = vld [vmem:[%s6308_s2 + $0x1ec] sm:$0xf0]  ;;  %v3066_v26 = vor.u32 %v3801_v17, %v3065_v16  ;;  %s3761_s23 = sshll.u32 %s6396_s28, 5 }
   0xd   : > { %v3762_v22 = vld [vmem:[%s6307_s1] sm:$0xff]  ;;  %v3764_v23 = vld [vmem:[%s6307_s1 + $0x10] sm:$0xff]  ;;  %v3194_v27 = vor.u32 %v3833_v19, %v3193_v18  ;;  %s6284_s28 = scalar_lea.vmem %s6314_s8, %s3761_s23 }
   0xe   : > { %s300_s10 = scalar_lea.vmem %s6306_s0, %s3969_s29  ;;  %v3799_v24 = vld [vmem:[%s6308_s2 + $0xe4] sm:$0xf]  ;;  %v3067_v25 = vld [vmem:[%s6308_s2 + $0xf0] sm:$0xf0]  ;;  %v3049_v30 = vld [vmem:[%s6308_s2 + $0xc0] sm:$0xf] }
   0xf   : > { %v2939_v0 = vld [vmem:[%s300_s10 + $0x20] sm:$0xf]  ;;  %v3770_v1 = vld [vmem:[%s300_s10 + $0x24] sm:$0xf0]  ;;  %v3769_v2 = vld [vmem:[%s300_s10 + $0x24] sm:$0xf]  ;;  %v3070_v34 = vor.u32 %v3799_v24, %v3067_v25 }
  0x10   : > { %v2940_v3 = vor.u32 %v3770_v1, %v2939_v0  ;;  %v2941_v4 = vld [vmem:[%s300_s10 + $0x28] sm:$0xf0]  ;;  %v2931_v5 = vld [vmem:[%s300_s10 + $0x10] sm:$0xf]  ;;  %v3768_v6 = vld [vmem:[%s300_s10 + $0x14] sm:$0xf0] }
  0x11   : > { %v2944_v7 = vor.u32 %v3769_v2, %v2941_v4  ;;  %v3767_v8 = vld [vmem:[%s300_s10 + $0x14] sm:$0xf]  ;;  %v2933_v9 = vld [vmem:[%s300_s10 + $0x18] sm:$0xf0]  ;;  %v2932_v10 = vor.u32 %v3768_v6, %v2931_v5  ;;  %v2923_v12 = vld [vmem:[%s300_s10] sm:$0xf] }
  0x12   : > { %444 = vmatpush.bf16.msra.mxu0 %v2940_v3  ;;  %3963 = vmatpush.bf16.msra.mxu2 %v2940_v3  ;;  %v2936_v11 = vor.u32 %v3767_v8, %v2933_v9  ;;  %v3766_v13 = vld [vmem:[%s300_s10 + $0x4] sm:$0xf0]  ;;  %v3765_v14 = vld [vmem:[%s300_s10 + $0x4] sm:$0xf]  ;;  %v2925_v15 = vld [vmem:[%s300_s10 + $0x8] sm:$0xf0] }
  0x13   : > { %468 = vmatpush.bf16.msra.mxu1 %v2944_v7  ;;  %3966 = vmatpush.bf16.msra.mxu3 %v2944_v7  ;;  %v2924_v20 = vor.u32 %v3766_v13, %v2923_v12  ;;  %v2928_v21 = vor.u32 %v3765_v14, %v2925_v15  ;;  %v3831_v28 = vld [vmem:[%s6308_s2 + $0x1e4] sm:$0xf]  ;;  %v3195_v29 = vld [vmem:[%s6308_s2 + $0x1f0] sm:$0xf0]  ;;  %v3797_v31 = vld [vmem:[%s6308_s2 + $0xcc] sm:$0xf0] }
  0x14   : > { %v3177_v32 = vld [vmem:[%s6308_s2 + $0x1c0] sm:$0xf]  ;;  %v3829_v33 = vld [vmem:[%s6308_s2 + $0x1cc] sm:$0xf0]  ;;  %v3198_v35 = vor.u32 %v3831_v28, %v3195_v29  ;;  %v3795_v36 = vld [vmem:[%s6308_s2 + $0xc4] sm:$0xf]  ;;  %v3050_v38 = vor.u32 %v3797_v31, %v3049_v30 }
  0x15   : > { %v3051_v37 = vld [vmem:[%s6308_s2 + $0xd0] sm:$0xf0]  ;;  %v3178_v39 = vor.u32 %v3829_v33, %v3177_v32  ;;  %v3827_v40 = vld [vmem:[%s6308_s2 + $0x1c4] sm:$0xf]  ;;  %v3033_v42 = vld [vmem:[%s6308_s2 + $0xa0] sm:$0xf] }
  0x16   : > { %445 = vmatpush.bf16.msra.mxu0 %v2932_v10  ;;  %3964 = vmatpush.bf16.msra.mxu2 %v2932_v10  ;;  %v3179_v41 = vld [vmem:[%s6308_s2 + $0x1d0] sm:$0xf0]  ;;  %v3793_v43 = vld [vmem:[%s6308_s2 + $0xac] sm:$0xf0]  ;;  %v3161_v44 = vld [vmem:[%s6308_s2 + $0x1a0] sm:$0xf]  ;;  %v3054_v46 = vor.u32 %v3795_v36, %v3051_v37 }
  0x17   : > { %469 = vmatpush.bf16.msra.mxu1 %v2936_v11  ;;  %3967 = vmatpush.bf16.msra.mxu3 %v2936_v11  ;;  %v3825_v45 = vld [vmem:[%s6308_s2 + $0x1ac] sm:$0xf0]  ;;  %v3182_v47 = vor.u32 %v3827_v40, %v3179_v41  ;;  %v3791_v48 = vld [vmem:[%s6308_s2 + $0xa4] sm:$0xf]  ;;  %v3035_v49 = vld [vmem:[%s6308_s2 + $0xb0] sm:$0xf0]  ;;  %v3034_v50 = vor.u32 %v3793_v43, %v3033_v42 }
  0x18   : > { %v3162_v51 = vor.u32 %v3825_v45, %v3161_v44  ;;  %v3823_v52 = vld [vmem:[%s6308_s2 + $0x1a4] sm:$0xf]  ;;  %v3163_v53 = vld [vmem:[%s6308_s2 + $0x1b0] sm:$0xf0]  ;;  %v3017_v54 = vld [vmem:[%s6308_s2 + $0x80] sm:$0xf]  ;;  %v3038_v58 = vor.u32 %v3791_v48, %v3035_v49 }
  0x19   : > { %v3789_v55 = vld [vmem:[%s6308_s2 + $0x8c] sm:$0xf0]  ;;  %v3145_v56 = vld [vmem:[%s6308_s2 + $0x180] sm:$0xf]  ;;  %v3166_v59 = vor.u32 %v3823_v52, %v3163_v53  ;;  %v3787_v60 = vld [vmem:[%s6308_s2 + $0x84] sm:$0xf] }
  0x1a   : > { %446 = vmatpush.bf16.msra.mxu0 %v2924_v20  ;;  %3965 = vmatpush.bf16.msra.mxu2 %v2924_v20  ;;  %v3821_v57 = vld [vmem:[%s6308_s2 + $0x18c] sm:$0xf0]  ;;  %v3019_v61 = vld [vmem:[%s6308_s2 + $0x90] sm:$0xf0]  ;;  %v3018_v62 = vor.u32 %v3789_v55, %v3017_v54  ;;  %v3819_v0 = vld [vmem:[%s6308_s2 + $0x184] sm:$0xf] }
  0x1b   : > { %470 = vmatpush.bf16.msra.mxu1 %v2928_v21  ;;  %3968 = vmatpush.bf16.msra.mxu3 %v2928_v21  ;;  %v3146_v63 = vor.u32 %v3821_v57, %v3145_v56  ;;  %v3147_v1 = vld [vmem:[%s6308_s2 + $0x190] sm:$0xf0]  ;;  %v3001_v2 = vld [vmem:[%s6308_s2 + $0x60] sm:$0xf]  ;;  %v3785_v3 = vld [vmem:[%s6308_s2 + $0x6c] sm:$0xf0]  ;;  %v3022_v6 = vor.u32 %v3787_v60, %v3019_v61 }
  0x1c   : > { %v3129_v4 = vld [vmem:[%s6308_s2 + $0x160] sm:$0xf]  ;;  %v3817_v5 = vld [vmem:[%s6308_s2 + $0x16c] sm:$0xf0]  ;;  %v3150_v7 = vor.u32 %v3819_v0, %v3147_v1  ;;  %v3783_v8 = vld [vmem:[%s6308_s2 + $0x64] sm:$0xf]  ;;  %v3002_v9 = vor.u32 %v3785_v3, %v3001_v2 }
  0x1d   : > { %2945 = vmatmul.msk.bf16.vlgmr.msra.gmra.mxu0 %vm6315_vm0, %v3762_v22  ;;  %2947 = vmatmul.msk.bf16.vlgmr.msra.gmra.mxu2 %vm6315_vm0, %v3764_v23  ;;  %v3130_v10 = vor.u32 %v3817_v5, %v3129_v4  ;;  %v3003_v11 = vld [vmem:[%s6308_s2 + $0x70] sm:$0xf0]  ;;  %v3815_v12 = vld [vmem:[%s6308_s2 + $0x164] sm:$0xf]  ;;  %v3763_v14 = vld [vmem:[%s6307_s1 + $0x8] sm:$0xff] }
  0x1e   : > { %822 = vmatpush.bf16.msrb.mxu2 %v3066_v26  ;;  %2948 = vmatmul.msk.bf16.vlgmr.msra.gmra.mxu1 %vm6315_vm0, %v3762_v22  ;;  %v3131_v13 = vld [vmem:[%s6308_s2 + $0x170] sm:$0xf0]  ;;  %v3006_v15 = vor.u32 %v3783_v8, %v3003_v11  ;;  %v2985_v17 = vld [vmem:[%s6308_s2 + $0x40] sm:$0xf]  ;;  %v3781_v18 = vld [vmem:[%s6308_s2 + $0x4c] sm:$0xf0] }
  0x1f   : > { %846 = vmatpush.bf16.msrb.mxu3 %v3194_v27  ;;  %870 = vmatpush.bf16.msrb.mxu0 %v3070_v34  ;;  %v3134_v16 = vor.u32 %v3815_v12, %v3131_v13  ;;  %v3113_v19 = vld [vmem:[%s6308_s2 + $0x140] sm:$0xf]  ;;  %v2986_v20 = vor.u32 %v3781_v18, %v2985_v17  ;;  %v3813_v21 = vld [vmem:[%s6308_s2 + $0x14c] sm:$0xf0]  ;;  %v3779_v22 = vld [vmem:[%s6308_s2 + $0x44] sm:$0xf] }
  0x20   : > { %2950 = vmatmul.msk.bf16.vlgmr.msra.gmra.mxu3 %vm6315_vm0, %v3764_v23  ;;  %894 = vmatpush.bf16.msrb.mxu1 %v3198_v35  ;;  %v2987_v23 = vld [vmem:[%s6308_s2 + $0x50] sm:$0xf0]  ;;  %v3114_v24 = vor.u32 %v3813_v21, %v3113_v19  ;;  %v3811_v26 = vld [vmem:[%s6308_s2 + $0x144] sm:$0xf]  ;;  %v2969_v29 = vld [vmem:[%s6308_s2 + $0x20] sm:$0xf] }
  0x21   : > { %v2990_v25 = vor.u32 %v3779_v22, %v2987_v23  ;;  %v3115_v27 = vld [vmem:[%s6308_s2 + $0x150] sm:$0xf0]  ;;  %v3777_v30 = vld [vmem:[%s6308_s2 + $0x2c] sm:$0xf0]  ;;  %v3097_v31 = vld [vmem:[%s6308_s2 + $0x120] sm:$0xf] }
  0x22   : > { %823 = vmatpush.bf16.msrb.mxu2 %v3050_v38  ;;  %v3118_v28 = vor.u32 %v3811_v26, %v3115_v27  ;;  %v2970_v32 = vor.u32 %v3777_v30, %v2969_v29  ;;  %v3809_v33 = vld [vmem:[%s6308_s2 + $0x12c] sm:$0xf0]  ;;  %v3775_v34 = vld [vmem:[%s6308_s2 + $0x24] sm:$0xf]  ;;  %v2971_v35 = vld [vmem:[%s6308_s2 + $0x30] sm:$0xf0] }
  0x23   : > { %847 = vmatpush.bf16.msrb.mxu3 %v3178_v39  ;;  %871 = vmatpush.bf16.msrb.mxu0 %v3054_v46  ;;  %v3098_v36 = vor.u32 %v3809_v33, %v3097_v31  ;;  %v2974_v37 = vor.u32 %v3775_v34, %v2971_v35  ;;  %v3807_v38 = vld [vmem:[%s6308_s2 + $0x124] sm:$0xf]  ;;  %v3099_v39 = vld [vmem:[%s6308_s2 + $0x130] sm:$0xf0]  ;;  %v2953_v41 = vld [vmem:[%s6308_s2] sm:$0xf] }
  0x24   : > { %895 = vmatpush.bf16.msrb.mxu1 %v3182_v47  ;;  %v3102_v40 = vor.u32 %v3807_v38, %v3099_v39  ;;  %v3773_v42 = vld [vmem:[%s6308_s2 + $0xc] sm:$0xf0]  ;;  %v3081_v43 = vld [vmem:[%s6308_s2 + $0x100] sm:$0xf]  ;;  %v3771_v46 = vld [vmem:[%s6308_s2 + $0x4] sm:$0xf] }
  0x25   : > { %v2954_v44 = vor.u32 %v3773_v42, %v2953_v41  ;;  %v3805_v45 = vld [vmem:[%s6308_s2 + $0x10c] sm:$0xf0]  ;;  %v2955_v47 = vld [vmem:[%s6308_s2 + $0x10] sm:$0xf0]  ;;  %v3073_v53 = vld [vmem:[%s6308_s2 + $0xe8] sm:$0xf] }
  0x26   : > { %824 = vmatpush.bf16.msrb.mxu2 %v3034_v50  ;;  %v3082_v48 = vor.u32 %v3805_v45, %v3081_v43  ;;  %v2958_v49 = vor.u32 %v3771_v46, %v2955_v47  ;;  %v3803_v50 = vld [vmem:[%s6308_s2 + $0x104] sm:$0xf]  ;;  %v3802_v54 = vld [vmem:[%s6308_s2 + $0xf4] sm:$0xf0]  ;;  %v3201_v55 = vld [vmem:[%s6308_s2 + $0x1e8] sm:$0xf] }
  0x27   : > { %848 = vmatpush.bf16.msrb.mxu3 %v3162_v51  ;;  %872 = vmatpush.bf16.msrb.mxu0 %v3038_v58  ;;  %v3083_v51 = vld [vmem:[%s6308_s2 + $0x110] sm:$0xf0]  ;;  %v3074_v56 = vor.u32 %v3802_v54, %v3073_v53  ;;  %v3834_v57 = vld [vmem:[%s6308_s2 + $0x1f4] sm:$0xf0]  ;;  %v3800_v58 = vld [vmem:[%s6308_s2 + $0xec] sm:$0xf] }
  0x28   : > { %896 = vmatpush.bf16.msrb.mxu1 %v3166_v59  ;;  %v3086_v52 = vor.u32 %v3803_v50, %v3083_v51  ;;  %v3075_v59 = vld [vmem:[%s6308_s2 + $0xf8] sm:$0xf0]  ;;  %v3202_v60 = vor.u32 %v3834_v57, %v3201_v55  ;;  %v3057_v0 = vld [vmem:[%s6308_s2 + $0xc8] sm:$0xf]  ;;  %v3798_v2 = vld [vmem:[%s6308_s2 + $0xd4] sm:$0xf0] }
  0x29   : > { %v3078_v61 = vor.u32 %v3800_v58, %v3075_v59  ;;  %v3185_v3 = vld [vmem:[%s6308_s2 + $0x1c8] sm:$0xf]  ;;  %v3830_v4 = vld [vmem:[%s6308_s2 + $0x1d4] sm:$0xf0]  ;;  %v3058_v5 = vor.u32 %v3798_v2, %v3057_v0  ;;  %v3059_v8 = vld [vmem:[%s6308_s2 + $0xd8] sm:$0xf0] }
  0x2a   : > { %825 = vmatpush.bf16.msrb.mxu2 %v3018_v62  ;;  %v3832_v62 = vld [vmem:[%s6308_s2 + $0x1ec] sm:$0xf]  ;;  %v3187_v11 = vld [vmem:[%s6308_s2 + $0x1d8] sm:$0xf0]  ;;  %v3041_v12 = vld [vmem:[%s6308_s2 + $0xa8] sm:$0xf] }
  0x2b   : > { %849 = vmatpush.bf16.msrb.mxu3 %v3146_v63  ;;  %873 = vmatpush.bf16.msrb.mxu0 %v3022_v6  ;;  %v3203_v63 = vld [vmem:[%s6308_s2 + $0x1f8] sm:$0xf0]  ;;  %v3186_v6 = vor.u32 %v3830_v4, %v3185_v3  ;;  %v3794_v13 = vld [vmem:[%s6308_s2 + $0xb4] sm:$0xf0]  ;;  %v3792_v18 = vld [vmem:[%s6308_s2 + $0xac] sm:$0xf] }
  0x2c   : > { %897 = vmatpush.bf16.msrb.mxu1 %v3150_v7  ;;  %v3206_v1 = vor.u32 %v3832_v62, %v3203_v63  ;;  %v3796_v7 = vld [vmem:[%s6308_s2 + $0xcc] sm:$0xf]  ;;  %v3826_v17 = vld [vmem:[%s6308_s2 + $0x1b4] sm:$0xf0]  ;;  %v3043_v21 = vld [vmem:[%s6308_s2 + $0xb8] sm:$0xf0] }
  0x2d   : > { %2946 = vmatmul.msk.bf16.gmra.mxu0 %vm6315_vm0, %v3763_v14  ;;  %v3824_v22 = vld [vmem:[%s6308_s2 + $0x1ac] sm:$0xf]  ;;  %v3171_v23 = vld [vmem:[%s6308_s2 + $0x1b8] sm:$0xf0]  ;;  %v3025_v26 = vld [vmem:[%s6308_s2 + $0x88] sm:$0xf] }
  0x2e   : > { %826 = vmatpush.bf16.msrb.mxu2 %v3002_v9  ;;  %2949 = vmatmul.msk.bf16.gmra.mxu1 %vm6315_vm0, %v3763_v14  ;;  %v3828_v9 = vld [vmem:[%s6308_s2 + $0x1cc] sm:$0xf]  ;;  %v3790_v27 = vld [vmem:[%s6308_s2 + $0x94] sm:$0xf0]  ;;  %v3174_v29 = vor.u32 %v3824_v22, %v3171_v23  ;;  %v3009_v43 = vld [vmem:[%s6308_s2 + $0x68] sm:$0xf] }
  0x2f   : > { %850 = vmatpush.bf16.msrb.mxu3 %v3130_v10  ;;  %874 = vmatpush.bf16.msrb.mxu0 %v3006_v15  ;;  %v3062_v10 = vor.u32 %v3796_v7, %v3059_v8  ;;  %v3190_v15 = vor.u32 %v3828_v9, %v3187_v11  ;;  %v3822_v30 = vld [vmem:[%s6308_s2 + $0x194] sm:$0xf0]  ;;  %v3788_v31 = vld [vmem:[%s6308_s2 + $0x8c] sm:$0xf]  ;;  %v3026_v33 = vor.u32 %v3790_v27, %v3025_v26  ;;  %v3137_v45 = vld [vmem:[%s6308_s2 + $0x168] sm:$0xf] }
  0x30   : > { %898 = vmatpush.bf16.msrb.mxu1 %v3134_v16  ;;  %v3169_v16 = vld [vmem:[%s6308_s2 + $0x1a8] sm:$0xf]  ;;  %v3818_v47 = vld [vmem:[%s6308_s2 + $0x174] sm:$0xf0]  ;;  %v3139_v53 = vld [vmem:[%s6308_s2 + $0x178] sm:$0xf0] }
  0x31   : > { %v3138_v50 = vor.u32 %v3818_v47, %v3137_v45  ;;  %v2993_v54 = vld [vmem:[%s6308_s2 + $0x48] sm:$0xf]  ;;  %v3814_v58 = vld [vmem:[%s6308_s2 + $0x154] sm:$0xf0]  ;;  %v2995_v62 = vld [vmem:[%s6308_s2 + $0x58] sm:$0xf0] }
  0x32   : > { %827 = vmatpush.bf16.msrb.mxu2 %v2986_v20  ;;  %v3042_v20 = vor.u32 %v3794_v13, %v3041_v12  ;;  %v3121_v57 = vld [vmem:[%s6308_s2 + $0x148] sm:$0xf]  ;;  %v3812_v63 = vld [vmem:[%s6308_s2 + $0x14c] sm:$0xf]  ;;  %v3778_v3 = vld [vmem:[%s6308_s2 + $0x34] sm:$0xf0] }
  0x33   : > { %851 = vmatpush.bf16.msrb.mxu3 %v3114_v24  ;;  %875 = vmatpush.bf16.msrb.mxu0 %v2990_v25  ;;  %v3170_v24 = vor.u32 %v3826_v17, %v3169_v16  ;;  %v3046_v25 = vor.u32 %v3792_v18, %v3043_v21  ;;  %v2977_v2 = vld [vmem:[%s6308_s2 + $0x28] sm:$0xf]  ;;  %v3776_v7 = vld [vmem:[%s6308_s2 + $0x2c] sm:$0xf]  ;;  %v2979_v11 = vld [vmem:[%s6308_s2 + $0x38] sm:$0xf0] }
  0x34   : > { %899 = vmatpush.bf16.msrb.mxu1 %v3118_v28  ;;  %v3153_v28 = vld [vmem:[%s6308_s2 + $0x188] sm:$0xf]  ;;  %v3808_v12 = vld [vmem:[%s6308_s2 + $0x12c] sm:$0xf]  ;;  %v3107_v13 = vld [vmem:[%s6308_s2 + $0x138] sm:$0xf0] }
  0x35   : > { %v3154_v34 = vor.u32 %v3822_v30, %v3153_v28  ;;  %v2961_v16 = vld [vmem:[%s6308_s2 + $0x8] sm:$0xf]  ;;  %v3774_v17 = vld [vmem:[%s6308_s2 + $0x14] sm:$0xf0]  ;;  %v2963_v21 = vld [vmem:[%s6308_s2 + $0x18] sm:$0xf0]  ;;  %v3110_v22 = vor.u32 %v3808_v12, %v3107_v13 }
  0x36   : > { %828 = vmatpush.bf16.msrb.mxu2 %v2970_v32  ;;  %v3027_v32 = vld [vmem:[%s6308_s2 + $0x98] sm:$0xf0]  ;;  %v3089_v18 = vld [vmem:[%s6308_s2 + $0x108] sm:$0xf]  ;;  %v2962_v23 = vor.u32 %v3774_v17, %v2961_v16  ;;  %v3804_v26 = vld [vmem:[%s6308_s2 + $0x10c] sm:$0xf] }
  0x37   : > { %852 = vmatpush.bf16.msrb.mxu3 %v3098_v36  ;;  %876 = vmatpush.bf16.msrb.mxu0 %v2974_v37  ;;  %v3030_v35 = vor.u32 %v3788_v31, %v3027_v32  ;;  %v3820_v36 = vld [vmem:[%s6308_s2 + $0x18c] sm:$0xf]  ;;  %v3155_v37 = vld [vmem:[%s6308_s2 + $0x198] sm:$0xf0] }
  0x38   : > { %900 = vmatpush.bf16.msrb.mxu1 %v3102_v40  ;;  %v3158_v41 = vor.u32 %v3820_v36, %v3155_v37  ;;  %v3091_v27 = vld [vmem:[%s6308_s2 + $0x118] sm:$0xf0] }
  0x39   : > { %v3094_v31 = vor.u32 %v3804_v26, %v3091_v27 }
  0x3a   : > { %829 = vmatpush.bf16.msrb.mxu2 %v2954_v44  ;;  %v3786_v44 = vld [vmem:[%s6308_s2 + $0x74] sm:$0xf0] }
  0x3b   : > { %853 = vmatpush.bf16.msrb.mxu3 %v3082_v48  ;;  %877 = vmatpush.bf16.msrb.mxu0 %v2958_v49  ;;  %v3010_v46 = vor.u32 %v3786_v44, %v3009_v43  ;;  %v3784_v48 = vld [vmem:[%s6308_s2 + $0x6c] sm:$0xf]  ;;  %v3011_v49 = vld [vmem:[%s6308_s2 + $0x78] sm:$0xf0] }
  0x3c   : > { %901 = vmatpush.bf16.msrb.mxu1 %v3086_v52  ;;  %v3014_v51 = vor.u32 %v3784_v48, %v3011_v49  ;;  %v3816_v52 = vld [vmem:[%s6308_s2 + $0x16c] sm:$0xf] }
  0x3d   : > { %v3142_v55 = vor.u32 %v3816_v52, %v3139_v53 }
  0x3e   : > { %918 = vmatpush.bf16.msra.mxu2 %v3074_v56  ;;  %v3782_v56 = vld [vmem:[%s6308_s2 + $0x54] sm:$0xf0] }
  0x3f   : > { %942 = vmatpush.bf16.msra.mxu3 %v3202_v60  ;;  %966 = vmatpush.bf16.msra.mxu0 %v3078_v61  ;;  %v2994_v59 = vor.u32 %v3782_v56, %v2993_v54  ;;  %v3122_v60 = vor.u32 %v3814_v58, %v3121_v57  ;;  %v3780_v61 = vld [vmem:[%s6308_s2 + $0x4c] sm:$0xf] }
  0x40   : > { %990 = vmatpush.bf16.msra.mxu1 %v3206_v1  ;;  %v2998_v0 = vor.u32 %v3780_v61, %v2995_v62  ;;  %v3123_v1 = vld [vmem:[%s6308_s2 + $0x158] sm:$0xf0] }
  0x41   : > { %v3126_v9 = vor.u32 %v3812_v63, %v3123_v1 }
  0x42   : > { %919 = vmatpush.bf16.msra.mxu2 %v3058_v5  ;;  %v3105_v5 = vld [vmem:[%s6308_s2 + $0x128] sm:$0xf] }
  0x43   : > { %943 = vmatpush.bf16.msra.mxu3 %v3186_v6  ;;  %967 = vmatpush.bf16.msra.mxu0 %v3062_v10  ;;  %v3810_v6 = vld [vmem:[%s6308_s2 + $0x134] sm:$0xf0]  ;;  %v2978_v10 = vor.u32 %v3778_v3, %v2977_v2 }
  0x44   : > { %991 = vmatpush.bf16.msra.mxu1 %v3190_v15  ;;  %v2982_v15 = vor.u32 %v3776_v7, %v2979_v11 }
  0x46   : > { %920 = vmatpush.bf16.msra.mxu2 %v3042_v20  ;;  %v3772_v20 = vld [vmem:[%s6308_s2 + $0xc] sm:$0xf] }
  0x47   : > { %944 = vmatpush.bf16.msra.mxu3 %v3170_v24  ;;  %968 = vmatpush.bf16.msra.mxu0 %v3046_v25  ;;  %v2966_v25 = vor.u32 %v3772_v20, %v2963_v21 }
  0x48   : > { %992 = vmatpush.bf16.msra.mxu1 %v3174_v29 }
  0x4a   : > { %921 = vmatpush.bf16.msra.mxu2 %v3026_v33 }
  0x4b   : > { %945 = vmatpush.bf16.msra.mxu3 %v3154_v34  ;;  %969 = vmatpush.bf16.msra.mxu0 %v3030_v35 }
  0x4c   : > { %993 = vmatpush.bf16.msra.mxu1 %v3158_v41 }
  0x4e   : > { %922 = vmatpush.bf16.msra.mxu2 %v3010_v46 }
  0x4f   : > { %946 = vmatpush.bf16.msra.mxu3 %v3138_v50  ;;  %970 = vmatpush.bf16.msra.mxu0 %v3014_v51 }
  0x50   : > { %994 = vmatpush.bf16.msra.mxu1 %v3142_v55 }
  0x52   : > { %923 = vmatpush.bf16.msra.mxu2 %v2994_v59 }
  0x53   : > { %947 = vmatpush.bf16.msra.mxu3 %v3122_v60  ;;  %971 = vmatpush.bf16.msra.mxu0 %v2998_v0 }
  0x54   : > { %995 = vmatpush.bf16.msra.mxu1 %v3126_v9 }
  0x56   : > { %924 = vmatpush.bf16.msra.mxu2 %v2978_v10 }
  0x57   : > { %972 = vmatpush.bf16.msra.mxu0 %v2982_v15 }
  0x58   : > { %996 = vmatpush.bf16.msra.mxu1 %v3110_v22 }
  0x5a   : > { %925 = vmatpush.bf16.msra.mxu2 %v2962_v23 }
  0x5b   : > { %973 = vmatpush.bf16.msra.mxu0 %v2966_v25 }
  0x5c   : > { %997 = vmatpush.bf16.msra.mxu1 %v3094_v31 }
  0x9a   : > { %v448_v14 = vpop.f32.mrf.mxu0 }
  0x9b   : > { %v472_v19 = vpop.f32.mrf.mxu1 }
  0xa0   : > { %v458_v33 = vpop.f32.mrf.mxu2 }
  0xa2   : > { %v450_v38 = vpop.f32.mrf.mxu0 }
  0xa3   : > { %v4466_v39 = vpack.c.bf16 %v450_v38, %v448_v14  ;;  %v474_v40 = vpop.f32.mrf.mxu1  ;;  %v3106_v14 = vor.u32 %v3810_v6, %v3105_v5  ;;  %v482_v34 = vpop.f32.mrf.mxu3 }
  0xa4   : > { %v4468_v42 = vpack.c.bf16 %v474_v40, %v472_v19  ;;  %v3806_v19 = vld [vmem:[%s6308_s2 + $0x114] sm:$0xf0]  ;;  %v383_v40 = vld [vmem:[%s6309_s3] sm:$0xf] }
  0xa5   : > { %830 = vmatmul.bf16.vlgmr.msrb.gmra.mxu2 %v4466_v39  ;;  %878 = vmatmul.bf16.vlgmr.msrb.gmra.mxu0 %v4466_v39  ;;  %v3090_v24 = vor.u32 %v3806_v19, %v3089_v18  ;;  %v4577_v41 = vperm.slane %v383_v40, 1  ;;  %v4619_v12 = vperm.slane %v383_v40, 3  ;;  %v4626_v20 = vperm.slane %v383_v40, 2 }
  0xa6   : > { %854 = vmatmul.bf16.vlgmr.msrb.gmra.mxu3 %v4468_v42  ;;  %902 = vmatmul.bf16.vlgmr.msrb.gmra.mxu1 %v4468_v42 }
  0xa7   : > { %948 = vmatpush.bf16.msra.mxu3 %v3106_v14 }
  0xa8   : > { %v460_v35 = vpop.f32.mrf.mxu2 }
  0xa9   : > { %v491_v37 = vpack.c.bf16 %v460_v35, %v458_v33 }
  0xaa   : > { %v453_v4 = vpop.f32.mrf.mxu0 }
  0xab   : > { %v477_v8 = vpop.f32.mrf.mxu1  ;;  %949 = vmatpush.bf16.msra.mxu3 %v3090_v24  ;;  %v484_v36 = vpop.f32.mrf.mxu3 }
  0xac   : > { %v492_v38 = vpack.c.bf16 %v484_v36, %v482_v34 }
  0xb2   : > { %v455_v28 = vpop.f32.mrf.mxu0 }
  0xb3   : > { %v489_v29 = vpack.c.bf16 %v455_v28, %v453_v4  ;;  %v479_v30 = vpop.f32.mrf.mxu1 }
  0xb4   : > { %v490_v32 = vpack.c.bf16 %v479_v30, %v477_v8 }
  0xb5   : > { %835 = vmatmul.bf16.gmra.mxu2 %v489_v29  ;;  %883 = vmatmul.bf16.gmra.mxu0 %v489_v29 }
  0xb6   : > { %859 = vmatmul.bf16.gmra.mxu3 %v490_v32  ;;  %907 = vmatmul.bf16.gmra.mxu1 %v490_v32 }
  0xc5   : > { %840 = vmatmul.bf16.gmra.mxu2 %v491_v37  ;;  %888 = vmatmul.bf16.gmra.mxu0 %v491_v37 }
  0xc6   : > { %864 = vmatmul.bf16.gmra.mxu3 %v492_v38  ;;  %912 = vmatmul.bf16.gmra.mxu1 %v492_v38 }
  0xd5   : > { %926 = vmatmul.bf16.vlgmr.msra.gmra.mxu2 %v4466_v39  ;;  %974 = vmatmul.bf16.vlgmr.msra.gmra.mxu0 %v4466_v39 }
  0xd6   : > { %950 = vmatmul.bf16.vlgmr.msra.gmra.mxu3 %v4468_v42  ;;  %998 = vmatmul.bf16.vlgmr.msra.gmra.mxu1 %v4468_v42  ;;  %v4582_v42 = vperm.slane %v383_v40, 0 }
  0xe5   : > { %931 = vmatmul.bf16.gmra.mxu2 %v489_v29  ;;  %979 = vmatmul.bf16.gmra.mxu0 %v489_v29 }
  0xe6   : > { %955 = vmatmul.bf16.gmra.mxu3 %v490_v32  ;;  %1003 = vmatmul.bf16.gmra.mxu1 %v490_v32 }
  0xf5   : > { %936 = vmatmul.bf16.gmra.mxu2 %v491_v37  ;;  %984 = vmatmul.bf16.gmra.mxu0 %v491_v37 }
  0xf6   : > { %960 = vmatmul.bf16.gmra.mxu3 %v492_v38  ;;  %1008 = vmatmul.bf16.gmra.mxu1 %v492_v38 }
 0x122   : > { %v879_v43 = vpop.f32.mrf.mxu0 }
 0x123   : > { %v880_v39 = vadd.f32 %v879_v43, %v4577_v41  ;;  %v903_v44 = vpop.f32.mrf.mxu1 }
 0x125   : > { %v4580_v45 = vadd.f32 %v903_v44, %v880_v39 }
 0x128   : > { %v831_v46 = vpop.f32.mrf.mxu2 }
 0x129   : > { %v832_v47 = vadd.f32 %v831_v46, %v4582_v42  ;;  %v855_v48 = vpop.f32.mrf.mxu3 }
 0x12a   : > { %v4585_v49 = vpop.f32.mrf.mxu0 }
 0x12b   : > { %v4587_v50 = vadd.f32 %v855_v48, %v832_v47  ;;  %v4589_v51 = vpop.f32.mrf.mxu1 }
 0x130   : > { %v4591_v52 = vpop.f32.mrf.mxu2 }
 0x131   : > { %v4593_v53 = vpop.f32.mrf.mxu3 }
 0x132   : > { %v884_v54 = vpop.f32.mrf.mxu0 }
 0x133   : > { %v885_v55 = vadd.f32 %v884_v54, %v4577_v41  ;;  %v908_v56 = vpop.f32.mrf.mxu1 }
 0x135   : > { %v4596_v57 = vadd.f32 %v908_v56, %v885_v55 }
 0x138   : > { %v836_v58 = vpop.f32.mrf.mxu2 }
 0x139   : > { %v837_v59 = vadd.f32 %v836_v58, %v4582_v42  ;;  %v860_v60 = vpop.f32.mrf.mxu3 }
 0x13a   : > { %v4599_v61 = vpop.f32.mrf.mxu0 }
 0x13b   : > { %v4601_v62 = vadd.f32 %v860_v60, %v837_v59  ;;  %v4603_v63 = vpop.f32.mrf.mxu1 }
 0x140   : > { %v4605_v0 = vpop.f32.mrf.mxu2 }
 0x141   : > { %v4607_v1 = vpop.f32.mrf.mxu3 }
 0x142   : > { %v889_v2 = vpop.f32.mrf.mxu0 }
 0x143   : > { %v890_v3 = vadd.f32 %v889_v2, %v4577_v41  ;;  %v913_v4 = vpop.f32.mrf.mxu1 }
 0x145   : > { %v4610_v5 = vadd.f32 %v913_v4, %v890_v3 }
 0x148   : > { %v841_v6 = vpop.f32.mrf.mxu2 }
 0x149   : > { %v842_v7 = vadd.f32 %v841_v6, %v4582_v42  ;;  %v865_v8 = vpop.f32.mrf.mxu3 }
 0x14a   : > { %v4613_v9 = vpop.f32.mrf.mxu0 }
 0x14b   : > { %v4615_v10 = vadd.f32 %v865_v8, %v842_v7  ;;  %v4617_v11 = vpop.f32.mrf.mxu1 }
 0x150   : > { %v4621_v13 = vpop.f32.mrf.mxu2 }
 0x151   : > { %v4623_v14 = vpop.f32.mrf.mxu3 }
 0x152   : > { %v975_v15 = vpop.f32.mrf.mxu0 }
 0x153   : > { %v976_v16 = vadd.f32 %v975_v15, %v4619_v12  ;;  %v999_v17 = vpop.f32.mrf.mxu1 }
 0x155   : > { %v1000_v18 = vadd.f32 %v999_v17, %v976_v16 }
 0x157   : > { %v3208_v19 = vmul.f32 -1.442695, %v1000_v18 }
 0x158   : > { %v927_v21 = vpop.f32.mrf.mxu2 }
 0x159   : > { %v951_v22 = vpop.f32.mrf.mxu3  ;;  %3978 = vpow2.f32 %v3208_v19  ;;  %v928_v24 = vadd.f32 %v927_v21, %v4626_v20  ;;  %v882_v21 = vadd.f32 %v4585_v49, %v4577_v41 }
 0x15a   : > { %v977_v23 = vpop.f32.mrf.mxu0 }
 0x15b   : > { %v978_v25 = vadd.f32 %v977_v23, %v4619_v12  ;;  %v1001_v26 = vpop.f32.mrf.mxu1  ;;  %v952_v28 = vadd.f32 %v951_v22, %v928_v24 }
 0x15d   : > { %v1002_v27 = vadd.f32 %v1001_v26, %v978_v25  ;;  %v3207_v35 = vmul.f32 -1.442695, %v952_v28  ;;  %v887_v28 = vadd.f32 %v4599_v61, %v4577_v41  ;;  %v4665_v61 = vadd.f32 %v4591_v52, %v4582_v42 }
 0x15f   : > { %v3210_v29 = vmul.f32 -1.442695, %v1002_v27  ;;  %v3979_v31 = vpop.eup %3978 }
 0x160   : > { %v929_v30 = vpop.f32.mrf.mxu2  ;;  %v4632_v38 = vadd.f32 1.0, %v3979_v31 }
 0x161   : > { %v953_v32 = vpop.f32.mrf.mxu3  ;;  %3980 = vpow2.f32 %v3210_v29  ;;  %v930_v33 = vadd.f32 %v929_v30, %v4626_v20  ;;  %v839_v30 = vadd.f32 %v4605_v0, %v4582_v42  ;;  %v4670_v0 = vadd.f32 %v4603_v63, %v887_v28 }
 0x162   : > { %v980_v34 = vpop.f32.mrf.mxu0  ;;  %3982 = vpow2.f32 %v3207_v35  ;;  %vm1082_vm1 = vweird.f32 %v4632_v38 }
 0x163   : > { %v981_v36 = vadd.f32 %v980_v34, %v4619_v12  ;;  %v1004_v37 = vpop.f32.mrf.mxu1  ;;  %v954_v43 = vadd.f32 %v953_v32, %v930_v33  ;;  %3984 = vrcp.f32 %v4632_v38  ;;  %v4661_v33 = vadd.f32 %v4589_v51, %v882_v21 }
 0x165   : > { %v1005_v40 = vadd.f32 %v1004_v37, %v981_v36  ;;  %v3209_v54 = vmul.f32 -1.442695, %v954_v43  ;;  %v892_v36 = vadd.f32 %v4613_v9, %v4577_v41 }
 0x167   : > { %v3212_v39 = vmul.f32 -1.442695, %v1005_v40  ;;  %v3981_v44 = vpop.eup %3980  ;;  %v844_v40 = vadd.f32 %v4621_v13, %v4582_v42 }
 0x168   : > { %v932_v46 = vpop.f32.mrf.mxu2  ;;  %v4636_v56 = vadd.f32 1.0, %v3981_v44  ;;  %v3983_v2 = vpop.eup %3982  ;;  %v4678_v44 = vadd.f32 %v4607_v1, %v839_v30 }
 0x169   : > { %3986 = vpow2.f32 %v3212_v39  ;;  %v933_v47 = vadd.f32 %v932_v46, %v4626_v20  ;;  %v956_v48 = vpop.f32.mrf.mxu3  ;;  %v4639_v6 = vpop.eup %3984  ;;  %v4642_v15 = vadd.f32 1.0, %v3983_v2  ;;  %v1086_v39 = vand.u32 2147483647, %v4632_v38 }
 0x16a   : > { %v982_v55 = vpop.f32.mrf.mxu0  ;;  %3988 = vpow2.f32 %v3209_v54  ;;  %v1078_v22 = vmul.f32 %v4639_v6, %v4632_v38  ;;  %vm1083_vm2 = vweird.f32 %v4639_v6  ;;  %vm1112_vm5 = vweird.f32 %v4636_v56 }
 0x16b   : > { %v957_v58 = vadd.f32 %v956_v48, %v933_v47  ;;  %v983_v59 = vadd.f32 %v982_v55, %v4619_v12  ;;  %v1006_v60 = vpop.f32.mrf.mxu1  ;;  %3990 = vrcp.f32 %v4636_v56  ;;  %v4694_v48 = vadd.f32 %v4617_v11, %v892_v36  ;;  %vm4729_vm4 = vmor %vm1082_vm1, %vm1083_vm2 }
 0x16c   : > { %v1079_v34 = vsub.f32 1.0, %v1078_v22  ;;  %vm4703_vm3 = vcmp.eq.f32.partialorder %v1086_v39, 8.507059e+37 }
 0x16d   : > { %v3211_v3 = vmul.f32 -1.442695, %v957_v58  ;;  %v1007_v4 = vadd.f32 %v1006_v60, %v983_v59  ;;  %v1088_v58 = vand.u32 2147483648, %v4632_v38  ;;  %v4699_v59 = vadd.f32 %v4623_v14, %v844_v40 }
 0x16e   : > { %v1080_v47 = vmul.f32 %v4639_v6, %v1079_v34 }
 0x16f   : > { %v3987_v7 = vpop.eup %3986  ;;  %v3214_v8 = vmul.f32 -1.442695, %v1007_v4  ;;  %3992 = vpow2.f32 %v3211_v3  ;;  %v1089_v21 = vor.u32 1.1754944e-38, %v1088_v58 }
 0x170   : > { %v934_v16 = vpop.f32.mrf.mxu2  ;;  %v4644_v17 = vadd.f32 1.0, %v3987_v7  ;;  %v3989_v27 = vpop.eup %3988 }
 0x171   : > { %3994 = vpow2.f32 %v3214_v8  ;;  %v935_v18 = vadd.f32 %v934_v16, %v4626_v20  ;;  %v958_v19 = vpop.f32.mrf.mxu3  ;;  %v4655_v29 = vpop.eup %3990  ;;  %v4680_v52 = vadd.f32 1.0, %v3989_v27  ;;  %v1081_v8 = vadd.f32 %v4639_v6, %v1080_v47 }
 0x172   : > { %v985_v23 = vpop.f32.mrf.mxu0  ;;  %3996 = vrcp.f32 %v4642_v15  ;;  %v1108_v63 = vmul.f32 %v4655_v29, %v4636_v56  ;;  %v1071_v27 = vand.u32 2147483647, %v4642_v15  ;;  %vm1142_vm6 = vweird.f32 %v4644_v17 }
 0x173   : > { %v959_v24 = vadd.f32 %v958_v19, %v935_v18  ;;  %v986_v25 = vadd.f32 %v985_v23, %v4619_v12  ;;  %v1009_v26 = vpop.f32.mrf.mxu1  ;;  %3998 = vrcp.f32 %v4644_v17  ;;  %vm1113_vm8 = vweird.f32 %v4655_v29 }
 0x174   : > { %v1109_v7 = vsub.f32 1.0, %v1108_v63  ;;  %vm4789_vm10 = vmor %vm1112_vm5, %vm1113_vm8 }
 0x175   : > { %v3213_v49 = vmul.f32 -1.442695, %v959_v24  ;;  %v1010_v31 = vadd.f32 %v1009_v26, %v986_v25  ;;  %v3993_v32 = vpop.eup %3992  ;;  %v1116_v25 = vand.u32 2147483647, %v4636_v56  ;;  %v1118_v26 = vand.u32 2147483648, %v4636_v56 }
 0x176   : > { %v4687_v42 = vadd.f32 1.0, %v3993_v32 }
 0x177   : > { %v3995_v35 = vpop.eup %3994  ;;  %4000 = vpow2.f32 %v3213_v49  ;;  %v3216_v37 = vmul.f32 -1.442695, %v1010_v31  ;;  %v1148_v49 = vand.u32 2147483648, %v4644_v17  ;;  %vm4748_vm7 = vcmp.eq.f32.partialorder %v1116_v25, 8.507059e+37 }
 0x178   : > { %v4674_v43 = vadd.f32 1.0, %v3995_v35  ;;  %v937_v51 = vpop.f32.mrf.mxu2  ;;  %v4683_v46 = vpop.eup %3996  ;;  %v1085_v35 = vsel %vm4729_vm4, %v4639_v6, %v1081_v8  ;;  %v1119_v39 = vor.u32 1.1754944e-38, %v1118_v26  ;;  %v1101_v8 = vand.u32 2147483647, %v4680_v52 }
 0x179   : > { %4002 = vpow2.f32 %v3216_v37  ;;  %v938_v41 = vadd.f32 %v937_v51, %v4626_v20  ;;  %v961_v9 = vpop.f32.mrf.mxu3  ;;  %v4691_v1 = vpop.eup %3998  ;;  %v1063_v11 = vmul.f32 %v4683_v46, %v4642_v15  ;;  %v1146_v51 = vand.u32 2147483647, %v4644_v17 }
 0x17a   : > { %4004 = vrcp.f32 %v4674_v43  ;;  %v987_v13 = vpop.f32.mrf.mxu0  ;;  %v1138_v14 = vmul.f32 %v4691_v1, %v4644_v17  ;;  %v4755_v47 = vsel %vm4703_vm3, %v1089_v21, %v1085_v35  ;;  %v1131_v26 = vand.u32 2147483647, %v4687_v42 }
 0x17b   : > { %v962_v54 = vadd.f32 %v961_v9, %v938_v41  ;;  %v988_v55 = vadd.f32 %v987_v13, %v4619_v12  ;;  %v1011_v60 = vpop.f32.mrf.mxu1  ;;  %4006 = vrcp.f32 %v4680_v52  ;;  %v1064_v28 = vsub.f32 1.0, %v1063_v11 }
 0x17c   : > { %4008 = vrcp.f32 %v4687_v42  ;;  %v1139_v32 = vsub.f32 1.0, %v1138_v14  ;;  %v1073_v41 = vand.u32 2147483648, %v4642_v15  ;;  %v1149_v13 = vor.u32 1.1754944e-38, %v1148_v49 }
 0x17d   : > { %v4001_v3 = vpop.eup %4000  ;;  %v3215_v12 = vmul.f32 -1.442695, %v962_v54  ;;  %v1012_v4 = vadd.f32 %v1011_v60, %v988_v55  ;;  %v1065_v60 = vmul.f32 %v4683_v46, %v1064_v28  ;;  %v1178_v14 = vand.u32 2147483648, %v4674_v43 }
 0x17e   : > { %v4714_v18 = vadd.f32 1.0, %v4001_v3  ;;  %v1140_v55 = vmul.f32 %v4691_v1, %v1139_v32  ;;  %vm4780_vm9 = vcmp.eq.f32.partialorder %v1146_v51, 8.507059e+37  ;;  %v1103_v28 = vand.u32 2147483648, %v4680_v52 }
 0x17f   : > { %v4003_v16 = vpop.eup %4002  ;;  %4010 = vpow2.f32 %v3215_v12  ;;  %v3218_v19 = vmul.f32 -1.442695, %v1012_v4  ;;  %vm1143_vm11 = vweird.f32 %v4691_v1  ;;  %vm1172_vm12 = vweird.f32 %v4674_v43 }
 0x180   : > { %v4716_v22 = vpop.eup %4004  ;;  %v4718_v23 = vadd.f32 1.0, %v4003_v16  ;;  %v939_v24 = vpop.f32.mrf.mxu2  ;;  %vm4812_vm13 = vmor %vm1142_vm6, %vm1143_vm11  ;;  %vm1157_vm6 = vweird.f32 %v4714_v18  ;;  %v1163_v21 = vand.u32 2147483648, %v4714_v18  ;;  %vm1127_vm8 = vweird.f32 %v4687_v42 }
 0x181   : > { %4012 = vpow2.f32 %v3218_v19  ;;  %v940_v30 = vadd.f32 %v939_v24, %v4626_v20  ;;  %v963_v34 = vpop.f32.mrf.mxu3  ;;  %v1110_v20 = vmul.f32 %v4655_v29, %v1109_v7  ;;  %v4738_v36 = vpop.eup %4006  ;;  %v1168_v37 = vmul.f32 %v4716_v22, %v4674_v43 }
 0x182   : > { %4014 = vrcp.f32 %v4718_v23  ;;  %v4744_v40 = vpop.eup %4008  ;;  %v4765_v11 = vmul.f32 %v4738_v36, %v4680_v52  ;;  %v1176_v24 = vand.u32 2147483647, %v4674_v43  ;;  %vm1202_vm15 = vweird.f32 %v4718_v23 }
 0x183   : > { %4016 = vrcp.f32 %v4714_v18  ;;  %v964_v38 = vadd.f32 %v963_v34, %v940_v30  ;;  %v1111_v58 = vadd.f32 %v4655_v29, %v1110_v20  ;;  %v1123_v2 = vmul.f32 %v4744_v40, %v4687_v42 }
 0x184   : > { %v1169_v12 = vsub.f32 1.0, %v1168_v37  ;;  %v1141_v30 = vadd.f32 %v4691_v1, %v1140_v55  ;;  %v1094_v56 = vsub.f32 1.0, %v4765_v11  ;;  %v1179_v20 = vor.u32 1.1754944e-38, %v1178_v14 }
 0x185   : > { %v4011_v9 = vpop.eup %4010  ;;  %v3217_v63 = vmul.f32 -1.442695, %v964_v38  ;;  %v1115_v49 = vsel %vm4789_vm10, %v4655_v29, %v1111_v58  ;;  %v1124_v31 = vsub.f32 1.0, %v1123_v2  ;;  %v1133_v37 = vand.u32 2147483648, %v4687_v42 }
 0x186   : > { %v4758_v54 = vadd.f32 1.0, %v4011_v9  ;;  %v1170_v34 = vmul.f32 %v4716_v22, %v1169_v12  ;;  %v1206_v9 = vand.u32 2147483647, %v4718_v23  ;;  %v1208_v29 = vand.u32 2147483648, %v4718_v23 }
 0x187   : > { %v4013_v3 = vpop.eup %4012  ;;  %4018 = vpow2.f32 %v3217_v63  ;;  %vm4816_vm14 = vcmp.eq.f32.partialorder %v1176_v24, 8.507059e+37  ;;  %v4822_v58 = vsel %vm4748_vm7, %v1119_v39, %v1115_v49  ;;  %v1145_v17 = vsel %vm4812_vm13, %v4691_v1, %v1141_v30  ;;  %v3341_v30 = vld [vmem:[%s6310_s4 + $0xf0] sm:$0xf0] }
 0x188   : > { %v4769_v4 = vpop.eup %4014  ;;  %4020 = vrcp.f32 %v4758_v54  ;;  %v4772_v7 = vadd.f32 1.0, %v4013_v3  ;;  %v4833_v12 = vadd.f32 %v4683_v46, %v1065_v60  ;;  %v1171_v6 = vadd.f32 %v4716_v22, %v1170_v34 }
 0x189   : > { %v4776_v16 = vpop.eup %4016  ;;  %v1198_v19 = vmul.f32 %v4769_v4, %v4718_v23  ;;  %vm1173_vm1 = vweird.f32 %v4716_v22  ;;  %v1125_v39 = vmul.f32 %v4744_v40, %v1124_v31  ;;  %vm1203_vm2 = vweird.f32 %v4769_v4 }
 0x18a   : > { %4022 = vrcp.f32 %v4772_v7  ;;  %v1153_v35 = vmul.f32 %v4776_v16, %v4714_v18  ;;  %vm4844_vm3 = vcmp.eq.f32.partialorder %v1206_v9, 8.507059e+37  ;;  %v1209_v49 = vor.u32 1.1754944e-38, %v1208_v29  ;;  %vm4852_vm4 = vmor %vm1172_vm12, %vm1173_vm1 }
 0x18b   : > { %v1199_v32 = vsub.f32 1.0, %v1198_v19  ;;  %v1191_v34 = vand.u32 2147483647, %v4758_v54  ;;  %vm1128_vm5 = vweird.f32 %v4744_v40  ;;  %vm4863_vm7 = vmor %vm1202_vm15, %vm1203_vm2  ;;  %v1175_v43 = vsel %vm4852_vm4, %v4716_v22, %v1171_v6 }
 0x18c   : > { %v1154_v24 = vsub.f32 1.0, %v1153_v35  ;;  %v1161_v35 = vand.u32 2147483647, %v4714_v18  ;;  %v1238_v29 = vand.u32 2147483648, %v4772_v7  ;;  %v4876_v63 = vadd.f32 %v4744_v40, %v1125_v39 }
 0x18d   : > { %v4019_v38 = vpop.eup %4018  ;;  %v1200_v51 = vmul.f32 %v4769_v4, %v1199_v32  ;;  %v1150_v32 = vsel %vm4780_vm9, %v1149_v13, %v1145_v17  ;;  %vm1187_vm9 = vweird.f32 %v4758_v54  ;;  %v1236_v22 = vand.u32 2147483647, %v4772_v7 }
 0x18e   : > { %v4824_v3 = vpop.eup %4020  ;;  %v4827_v2 = vadd.f32 1.0, %v4019_v38  ;;  %v1155_v23 = vmul.f32 %v4776_v16, %v1154_v24  ;;  %vm1232_vm11 = vweird.f32 %v4772_v7  ;;  %vm4886_vm13 = vcmp.eq.f32.partialorder %v1191_v34, 8.507059e+37 }
 0x18f   : > { %v1183_v14 = vmul.f32 %v4824_v3, %v4758_v54  ;;  %v1201_v25 = vadd.f32 %v4769_v4, %v1200_v51  ;;  %vm1188_vm12 = vweird.f32 %v4824_v3  ;;  %vm1068_vm15 = vweird.f32 %v4683_v46 }
 0x190   : > { %v4023_v19 = vpop.eup %4022  ;;  %4024 = vrcp.f32 %v4827_v2  ;;  %vm1097_vm1 = vweird.f32 %v4680_v52  ;;  %v1156_v55 = vadd.f32 %v4776_v16, %v1155_v23  ;;  %vm1237_vm4 = vcmp.eq.f32.partialorder %v1236_v22, 8.507059e+37 }
 0x191   : > { %v1184_v1 = vsub.f32 1.0, %v1183_v14  ;;  %v1228_v60 = vmul.f32 %v4023_v19, %v4772_v7  ;;  %v1205_v9 = vsel %vm4863_vm7, %v4769_v4, %v1201_v25  ;;  %vm1233_vm10 = vweird.f32 %v4023_v19 }
 0x192   : > { %v1180_v4 = vsel %vm4816_vm14, %v1179_v20, %v1175_v43  ;;  %v1210_v24 = vsel %vm4844_vm3, %v1209_v49, %v1205_v9  ;;  %vm1234_vm2 = vmor %vm1232_vm11, %vm1233_vm10  ;;  %v1239_v7 = vor.u32 1.1754944e-38, %v1238_v29  ;;  %v1193_v20 = vand.u32 2147483648, %v4758_v54  ;;  %v3419_v29 = vld [vmem:[%s6310_s4 + $0x180] sm:$0xf] }
 0x193   : > { %v1185_v38 = vmul.f32 %v4824_v3, %v1184_v1  ;;  %v1229_v51 = vsub.f32 1.0, %v1228_v60  ;;  %vm1158_vm14 = vweird.f32 %v4776_v16  ;;  %vm4901_vm3 = vcmp.eq.f32.partialorder %v1131_v26, 8.507059e+37  ;;  %vm4914_vm10 = vmor %vm1187_vm9, %vm1188_vm12 }
 0x194   : > { %vm1067_vm7 = vweird.f32 %v4642_v15  ;;  %v1095_v49 = vmul.f32 %v4738_v36, %v1094_v56  ;;  %v1221_v26 = vand.u32 2147483647, %v4827_v2  ;;  %vm4928_vm9 = vmor %vm1157_vm6, %vm1158_vm14  ;;  %v4933_v54 = vmul.f32 %v1180_v4, %v4670_v0  ;;  %v3467_v15 = vld [vmem:[%s6310_s4 + $0x1e0] sm:$0xf] }
 0x195   : > { %v1230_v17 = vmul.f32 %v4023_v19, %v1229_v51  ;;  %v1186_v1 = vadd.f32 %v4824_v3, %v1185_v38  ;;  %v1251_v38 = vmul.f32 %v1210_v24, %v4610_v5  ;;  %v1223_v51 = vand.u32 2147483648, %v4827_v2  ;;  %vm4943_vm6 = vmor %vm1127_vm8, %vm1128_vm5  ;;  %v3893_v24 = vld [vmem:[%s6310_s4 + $0x1cc] sm:$0xf0] }
 0x196   : > { %v4025_v14 = vpop.eup %4024  ;;  %v1194_v43 = vor.u32 1.1754944e-38, %v1193_v20  ;;  %vm1217_vm12 = vweird.f32 %v4827_v2  ;;  %v1096_v0 = vadd.f32 %v4738_v36, %v1095_v49  ;;  %v1130_v4 = vsel %vm4943_vm6, %v4744_v40, %v4876_v63  ;;  %v3339_v20 = vld [vmem:[%s6310_s4 + $0xe0] sm:$0xf] }
 0x197   : > { %v1213_v39 = vmul.f32 %v4025_v14, %v4827_v2  ;;  %v1231_v25 = vadd.f32 %v4023_v19, %v1230_v17  ;;  %v1190_v11 = vsel %vm4914_vm10, %v4824_v3, %v1186_v1  ;;  %vm1218_vm11 = vweird.f32 %v4025_v14  ;;  %v3891_v1 = vld [vmem:[%s6310_s4 + $0x1c4] sm:$0xf] }
 0x198   : > { %v4950_v2 = vmul.f32 %v1150_v32, %v4596_v57  ;;  %vm1219_vm14 = vmor %vm1217_vm12, %vm1218_vm11  ;;  %v1224_v23 = vor.u32 1.1754944e-38, %v1223_v51  ;;  %v1164_v17 = vor.u32 1.1754944e-38, %v1163_v21  ;;  %vm1162_vm5 = vcmp.eq.f32.partialorder %v1161_v35, 8.507059e+37  ;;  %v3887_v51 = vld [vmem:[%s6310_s4 + $0x1a4] sm:$0xf] }
 0x199   : > { %v1214_v60 = vsub.f32 1.0, %v1213_v39  ;;  %v1235_v31 = vsel %vm1234_vm2, %v4023_v19, %v1231_v25  ;;  %vm1098_vm2 = vweird.f32 %v4738_v36  ;;  %v1245_v57 = vmul.f32 %v4822_v58, %v4661_v33  ;;  %v3435_v19 = vld [vmem:[%s6310_s4 + $0x1a0] sm:$0xf] }
 0x19a   : > { %v1240_v34 = vsel %vm1237_vm4, %v1239_v7, %v1235_v31  ;;  %vm1222_vm4 = vcmp.eq.f32.partialorder %v1221_v26, 8.507059e+37  ;;  %v1134_v32 = vor.u32 1.1754944e-38, %v1133_v37  ;;  %vm4968_vm8 = vmor %vm1097_vm1, %vm1098_vm2  ;;  %v1257_v18 = vpack.c.bf16 %v4933_v54, %v4950_v2  ;;  %v3453_v7 = vld [vmem:[%s6310_s4 + $0x1d0] sm:$0xf0]  ;;  %v3863_v31 = vld [vmem:[%s6310_s4 + $0xe4] sm:$0xf] }
 0x19b   : > { %v1253_v13 = vmul.f32 %v1240_v34, %v4694_v48  ;;  %v1215_v56 = vmul.f32 %v4025_v14, %v1214_v60  ;;  %v1160_v48 = vsel %vm4928_vm9, %v4776_v16, %v1156_v55  ;;  %v1195_v16 = vsel %vm4886_vm13, %v1194_v43, %v1190_v11  ;;  %vm1069_vm13 = vmor %vm1067_vm7, %vm1068_vm15  ;;  %v3865_v60 = vld [vmem:[%s6310_s4 + $0xec] sm:$0xf0]  ;;  %v3323_v11 = vld [vmem:[%s6310_s4 + $0xc0] sm:$0xf] }
 0x19c   : > { %v1165_v6 = vsel %vm1162_vm5, %v1164_v17, %v1160_v48  ;;  %v1250_v40 = vmul.f32 %v1195_v16, %v4615_v10  ;;  %v1100_v33 = vsel %vm4968_vm8, %v4738_v36, %v1096_v0  ;;  %v1243_v42 = vmul.f32 %v4755_v47, %v4580_v45  ;;  %v3889_v26 = vld [vmem:[%s6310_s4 + $0x1ac] sm:$0xf0]  ;;  %v3859_v43 = vld [vmem:[%s6310_s4 + $0xc4] sm:$0xf]  ;;  %v3325_v48 = vld [vmem:[%s6310_s4 + $0xd0] sm:$0xf0] }
 0x19d   : > { %v1259_v3 = vpack.c.bf16 %v1253_v13, %v1251_v38  ;;  %v1216_v9 = vadd.f32 %v4025_v14, %v1215_v56  ;;  %v1135_v37 = vsel %vm4901_vm3, %v1134_v32, %v1130_v4  ;;  %v1104_v10 = vor.u32 1.1754944e-38, %v1103_v28  ;;  %v3437_v13 = vld [vmem:[%s6310_s4 + $0x1b0] sm:$0xf0]  ;;  %v3861_v56 = vld [vmem:[%s6310_s4 + $0xcc] sm:$0xf0]  ;;  %v4091_v32 = vld [vmem:[%s6307_s1 + $0x8] sm:$0xff] }
 0x19e   : > { %v4990_v58 = vmul.f32 %v1165_v6, %v4678_v44  ;;  %v1070_v36 = vsel %vm1069_vm13, %v4683_v46, %v4833_v12  ;;  %vm1102_vm1 = vcmp.eq.f32.partialorder %v1101_v8, 8.507059e+37  ;;  %v1074_v45 = vor.u32 1.1754944e-38, %v1073_v41  ;;  %v3469_v8 = vld [vmem:[%s6310_s4 + $0x1f0] sm:$0xf0]  ;;  %v3451_v12 = vld [vmem:[%s6310_s4 + $0x1c0] sm:$0xf] }
 0x19f   : > { %1354 = vmatpush.bf16.msrb.mxu3 %v1259_v3  ;;  %v1220_v22 = vsel %vm1219_vm14, %v4025_v14, %v1216_v9  ;;  %v1105_v47 = vsel %vm1102_vm1, %v1104_v10, %v1100_v33  ;;  %v858_v63 = vadd.f32 %v4593_v53, %v4665_v61  ;;  %v1255_v28 = vpack.c.bf16 %v1245_v57, %v1243_v42  ;;  %v4090_v53 = vld [vmem:[%s6307_s1] sm:$0xff]  ;;  %v3897_v61 = vld [vmem:[%s6310_s4 + $0x1ec] sm:$0xf0]  ;;  %v3309_v57 = vld [vmem:[%s6310_s4 + $0xb0] sm:$0xf0] }
 0x1a0   : > { %v1225_v39 = vsel %vm1222_vm4, %v1224_v23, %v1220_v22  ;;  %v5001_v14 = vmul.f32 %v1135_v37, %v4601_v62  ;;  %vm1072_vm15 = vcmp.eq.f32.partialorder %v1071_v27, 8.507059e+37  ;;  %v3468_v27 = vor.u32 %v3897_v61, %v3467_v15  ;;  %v3885_v0 = vld [vmem:[%s6310_s4 + $0x18c] sm:$0xf0]  ;;  %v3307_v23 = vld [vmem:[%s6310_s4 + $0xa0] sm:$0xf] }
 0x1a1   : > { %v1252_v35 = vmul.f32 %v1225_v39, %v4699_v59  ;;  %v1075_v44 = vsel %vm1072_vm15, %v1074_v45, %v1070_v36  ;;  %v1244_v46 = vmul.f32 %v1105_v47, %v858_v63  ;;  %v3452_v55 = vor.u32 %v3893_v24, %v3451_v12  ;;  %v3857_v17 = vld [vmem:[%s6310_s4 + $0xac] sm:$0xf0]  ;;  %v3855_v22 = vld [vmem:[%s6310_s4 + $0xa4] sm:$0xf]  ;;  %v3421_v39 = vld [vmem:[%s6310_s4 + $0x190] sm:$0xf0] }
 0x1a2   : > { %v1256_v52 = vpack.c.bf16 %v4990_v58, %v5001_v14  ;;  %v1242_v41 = vmul.f32 %v1075_v44, %v4587_v50  ;;  %v3895_v50 = vld [vmem:[%s6310_s4 + $0x1e4] sm:$0xf]  ;;  %1732 = vmatpush.bf16.msrb.mxu1 %v3468_v27  ;;  %v3456_v49 = vor.u32 %v3891_v1, %v3453_v7  ;;  %v3340_v34 = vor.u32 %v3865_v60, %v3339_v20  ;;  %v3853_v33 = vld [vmem:[%s6310_s4 + $0x8c] sm:$0xf0]  ;;  %v3405_v45 = vld [vmem:[%s6310_s4 + $0x170] sm:$0xf0] }
 0x1a3   : > { %1355 = vmatpush.bf16.msrb.mxu3 %v1257_v18  ;;  %v1258_v59 = vpack.c.bf16 %v1252_v35, %v1250_v40  ;;  %v3472_v25 = vor.u32 %v3895_v50, %v3469_v8  ;;  %v3344_v38 = vor.u32 %v3863_v31, %v3341_v30  ;;  %v3324_v5 = vor.u32 %v3861_v56, %v3323_v11  ;;  %v3883_v4 = vld [vmem:[%s6310_s4 + $0x184] sm:$0xf]  ;;  %v3403_v40 = vld [vmem:[%s6310_s4 + $0x160] sm:$0xf]  ;;  %v3881_v37 = vld [vmem:[%s6310_s4 + $0x16c] sm:$0xf0] }
 0x1a4   : > { %v1254_v62 = vpack.c.bf16 %v1244_v46, %v1242_v41  ;;  %1708 = vmatpush.bf16.msrb.mxu0 %v3340_v34  ;;  %v3436_v3 = vor.u32 %v3889_v26, %v3435_v19  ;;  %v3328_v9 = vor.u32 %v3859_v43, %v3325_v48  ;;  %v3440_v16 = vor.u32 %v3887_v51, %v3437_v13  ;;  %v3291_v35 = vld [vmem:[%s6310_s4 + $0x80] sm:$0xf]  ;;  %v3851_v10 = vld [vmem:[%s6310_s4 + $0x84] sm:$0xf]  ;;  %v3877_v41 = vld [vmem:[%s6310_s4 + $0x14c] sm:$0xf0] }
 0x1a5   : > { %1330 = vmatpush.bf16.msrb.mxu2 %v1258_v59  ;;  %v3308_v6 = vor.u32 %v3857_v17, %v3307_v23  ;;  %v3420_v21 = vor.u32 %v3885_v0, %v3419_v29  ;;  %v3312_v18 = vor.u32 %v3855_v22, %v3309_v57  ;;  %v3424_v42 = vor.u32 %v3883_v4, %v3421_v39  ;;  %v3293_v59 = vld [vmem:[%s6310_s4 + $0x90] sm:$0xf0]  ;;  %v3879_v36 = vld [vmem:[%s6310_s4 + $0x164] sm:$0xf]  ;;  %v3387_v46 = vld [vmem:[%s6310_s4 + $0x140] sm:$0xf] }
 0x1a6   : > { %1733 = vmatpush.bf16.msrb.mxu1 %v3452_v55  ;;  %v3292_v47 = vor.u32 %v3853_v33, %v3291_v35  ;;  %v3404_v63 = vor.u32 %v3881_v37, %v3403_v40  ;;  %v3408_v44 = vor.u32 %v3879_v36, %v3405_v45  ;;  %v3389_v15 = vld [vmem:[%s6310_s4 + $0x150] sm:$0xf0]  ;;  %v3275_v61 = vld [vmem:[%s6310_s4 + $0x60] sm:$0xf]  ;;  %v3849_v50 = vld [vmem:[%s6310_s4 + $0x6c] sm:$0xf0] }
 0x1a7   : > { %1356 = vmatpush.bf16.msrb.mxu3 %v1255_v28  ;;  %v3296_v28 = vor.u32 %v3851_v10, %v3293_v59  ;;  %v3276_v8 = vor.u32 %v3849_v50, %v3275_v61  ;;  %v3847_v12 = vld [vmem:[%s6310_s4 + $0x64] sm:$0xf]  ;;  %v3277_v24 = vld [vmem:[%s6310_s4 + $0x70] sm:$0xf0]  ;;  %v3873_v7 = vld [vmem:[%s6310_s4 + $0x12c] sm:$0xf0] }
 0x1a8   : > { %1709 = vmatpush.bf16.msrb.mxu0 %v3324_v5  ;;  %v3280_v1 = vor.u32 %v3847_v12, %v3277_v24  ;;  %v3871_v20 = vld [vmem:[%s6310_s4 + $0x124] sm:$0xf]  ;;  %v3373_v55 = vld [vmem:[%s6310_s4 + $0x130] sm:$0xf0]  ;;  %v3259_v30 = vld [vmem:[%s6310_s4 + $0x40] sm:$0xf] }
 0x1a9   : > { %1331 = vmatpush.bf16.msrb.mxu2 %v1256_v52  ;;  %v4092_v52 = vld [vmem:[%s6307_s1 + $0x10] sm:$0xff]  ;;  %v3376_v31 = vor.u32 %v3871_v20, %v3373_v55  ;;  %v3843_v34 = vld [vmem:[%s6310_s4 + $0x44] sm:$0xf]  ;;  %v3355_v51 = vld [vmem:[%s6310_s4 + $0x100] sm:$0xf] }
 0x1aa   : > { %3222 = vmatmul.msk.bf16.vlgmr.msrb.gmra.mxu3 %vm6315_vm0, %v4090_v53  ;;  %1734 = vmatpush.bf16.msrb.mxu1 %v3436_v3  ;;  %v3261_v19 = vld [vmem:[%s6310_s4 + $0x50] sm:$0xf0]  ;;  %v3869_v13 = vld [vmem:[%s6310_s4 + $0x10c] sm:$0xf0]  ;;  %v3867_v11 = vld [vmem:[%s6310_s4 + $0x104] sm:$0xf] }
 0x1ab   : > { %1780 = vmatpush.bf16.msra.mxu3 %v3472_v25  ;;  %v3371_v25 = vld [vmem:[%s6310_s4 + $0x120] sm:$0xf]  ;;  %v3264_v26 = vor.u32 %v3843_v34, %v3261_v19  ;;  %v3356_v56 = vor.u32 %v3869_v13, %v3355_v51  ;;  %v3357_v5 = vld [vmem:[%s6310_s4 + $0x110] sm:$0xf0]  ;;  %v3841_v48 = vld [vmem:[%s6310_s4 + $0x2c] sm:$0xf0] }
 0x1ac   : > { %1710 = vmatpush.bf16.msrb.mxu0 %v3308_v6  ;;  %v3372_v60 = vor.u32 %v3873_v7, %v3371_v25  ;;  %v3243_v43 = vld [vmem:[%s6310_s4 + $0x20] sm:$0xf]  ;;  %v3360_v3 = vor.u32 %v3867_v11, %v3357_v5  ;;  %v3839_v29 = vld [vmem:[%s6310_s4 + $0x24] sm:$0xf]  ;;  %v3245_v0 = vld [vmem:[%s6310_s4 + $0x30] sm:$0xf0] }
 0x1ad   : > { %1332 = vmatpush.bf16.msrb.mxu2 %v1254_v62  ;;  %v3388_v62 = vor.u32 %v3877_v41, %v3387_v46  ;;  %v3227_v23 = vld [vmem:[%s6310_s4] sm:$0xf]  ;;  %v3837_v17 = vld [vmem:[%s6310_s4 + $0xc] sm:$0xf0]  ;;  %v3835_v22 = vld [vmem:[%s6310_s4 + $0x4] sm:$0xf] }
 0x1ae   : > { %1735 = vmatpush.bf16.msrb.mxu1 %v3420_v21  ;;  %v3228_v4 = vor.u32 %v3837_v17, %v3227_v23  ;;  %v3229_v39 = vld [vmem:[%s6310_s4 + $0x10] sm:$0xf0]  ;;  %v3898_v6 = vld [vmem:[%s6310_s4 + $0x1f4] sm:$0xf0]  ;;  %v3896_v21 = vld [vmem:[%s6310_s4 + $0x1ec] sm:$0xf] }
 0x1af   : > { %1781 = vmatpush.bf16.msra.mxu3 %v3456_v49  ;;  %v3845_v49 = vld [vmem:[%s6310_s4 + $0x4c] sm:$0xf0]  ;;  %v3232_v57 = vor.u32 %v3835_v22, %v3229_v39  ;;  %v3477_v40 = vld [vmem:[%s6310_s4 + $0x1f8] sm:$0xf0]  ;;  %v3894_v37 = vld [vmem:[%s6310_s4 + $0x1d4] sm:$0xf0] }
 0x1b0   : > { %3219 = vmatmul.msk.bf16.vlgmr.msrb.gmra.mxu2 %vm6315_vm0, %v4090_v53  ;;  %1711 = vmatpush.bf16.msrb.mxu0 %v3292_v47  ;;  %v3875_v53 = vld [vmem:[%s6310_s4 + $0x144] sm:$0xf]  ;;  %v3480_v35 = vor.u32 %v3896_v21, %v3477_v40  ;;  %v3892_v10 = vld [vmem:[%s6310_s4 + $0x1cc] sm:$0xf]  ;;  %v3461_v36 = vld [vmem:[%s6310_s4 + $0x1d8] sm:$0xf0] }
 0x1b1   : > { %1756 = vmatpush.bf16.msra.mxu2 %v3344_v38  ;;  %v3392_v27 = vor.u32 %v3875_v53, %v3389_v15  ;;  %v3260_v38 = vor.u32 %v3845_v49, %v3259_v30  ;;  %v3347_v45 = vld [vmem:[%s6310_s4 + $0xe8] sm:$0xf]  ;;  %v3866_v47 = vld [vmem:[%s6310_s4 + $0xf4] sm:$0xf0]  ;;  %v3445_v15 = vld [vmem:[%s6310_s4 + $0x1b8] sm:$0xf0] }
 0x1b2   : > { %1736 = vmatpush.bf16.msrb.mxu1 %v3404_v63  ;;  %v3464_v63 = vor.u32 %v3892_v10, %v3461_v36  ;;  %v3443_v46 = vld [vmem:[%s6310_s4 + $0x1a8] sm:$0xf]  ;;  %v3890_v53 = vld [vmem:[%s6310_s4 + $0x1b4] sm:$0xf0]  ;;  %v3860_v24 = vld [vmem:[%s6310_s4 + $0xcc] sm:$0xf] }
 0x1b3   : > { %1782 = vmatpush.bf16.msra.mxu3 %v3440_v16  ;;  %v3248_v16 = vor.u32 %v3839_v29, %v3245_v0  ;;  %v3444_v61 = vor.u32 %v3890_v53, %v3443_v46  ;;  %v3862_v12 = vld [vmem:[%s6310_s4 + $0xd4] sm:$0xf0]  ;;  %v3884_v30 = vld [vmem:[%s6310_s4 + $0x18c] sm:$0xf]  ;;  %v3429_v34 = vld [vmem:[%s6310_s4 + $0x198] sm:$0xf0] }
 0x1b4   : > { %1712 = vmatpush.bf16.msrb.mxu0 %v3276_v8  ;;  %v3331_v8 = vld [vmem:[%s6310_s4 + $0xc8] sm:$0xf]  ;;  %v3858_v19 = vld [vmem:[%s6310_s4 + $0xb4] sm:$0xf0]  ;;  %v3856_v13 = vld [vmem:[%s6310_s4 + $0xac] sm:$0xf] }
 0x1b5   : > { %1757 = vmatpush.bf16.msra.mxu2 %v3328_v9  ;;  %v3244_v9 = vor.u32 %v3841_v48, %v3243_v43  ;;  %v3332_v25 = vor.u32 %v3862_v12, %v3331_v8  ;;  %v3317_v11 = vld [vmem:[%s6310_s4 + $0xb8] sm:$0xf0]  ;;  %v3882_v43 = vld [vmem:[%s6310_s4 + $0x174] sm:$0xf0]  ;;  %v3880_v48 = vld [vmem:[%s6310_s4 + $0x16c] sm:$0xf] }
 0x1b6   : > { %1737 = vmatpush.bf16.msrb.mxu1 %v3388_v62  ;;  %v3888_v62 = vld [vmem:[%s6310_s4 + $0x1ac] sm:$0xf]  ;;  %v3320_v5 = vor.u32 %v3856_v13, %v3317_v11  ;;  %v3299_v23 = vld [vmem:[%s6310_s4 + $0x88] sm:$0xf]  ;;  %v3854_v17 = vld [vmem:[%s6310_s4 + $0x94] sm:$0xf0] }
 0x1b7   : > { %1783 = vmatpush.bf16.msra.mxu3 %v3424_v42  ;;  %v3459_v42 = vld [vmem:[%s6310_s4 + $0x1c8] sm:$0xf]  ;;  %v3448_v50 = vor.u32 %v3888_v62, %v3445_v15  ;;  %v3852_v22 = vld [vmem:[%s6310_s4 + $0x8c] sm:$0xf]  ;;  %v3300_v39 = vor.u32 %v3854_v17, %v3299_v23  ;;  %v3269_v62 = vld [vmem:[%s6310_s4 + $0x58] sm:$0xf0] }
 0x1b8   : > { %1713 = vmatpush.bf16.msrb.mxu0 %v3260_v38  ;;  %v3460_v59 = vor.u32 %v3894_v37, %v3459_v42  ;;  %v3315_v38 = vld [vmem:[%s6310_s4 + $0xa8] sm:$0xf]  ;;  %v3876_v40 = vld [vmem:[%s6310_s4 + $0x14c] sm:$0xf]  ;;  %v3850_v37 = vld [vmem:[%s6310_s4 + $0x74] sm:$0xf0] }
 0x1b9   : > { %1758 = vmatpush.bf16.msra.mxu2 %v3312_v18  ;;  %v3316_v51 = vor.u32 %v3858_v19, %v3315_v38  ;;  %v3848_v10 = vld [vmem:[%s6310_s4 + $0x6c] sm:$0xf]  ;;  %v3267_v46 = vld [vmem:[%s6310_s4 + $0x48] sm:$0xf]  ;;  %v3870_v8 = vld [vmem:[%s6310_s4 + $0x114] sm:$0xf0] }
 0x1ba   : > { %3223 = vmatmul.msk.bf16.gmra.mxu3 %vm6315_vm0, %v4091_v32  ;;  %1738 = vmatpush.bf16.msrb.mxu1 %v3372_v60  ;;  %v3427_v60 = vld [vmem:[%s6310_s4 + $0x188] sm:$0xf]  ;;  %v3844_v53 = vld [vmem:[%s6310_s4 + $0x4c] sm:$0xf]  ;;  %v3237_v11 = vld [vmem:[%s6310_s4 + $0x18] sm:$0xf0] }
 0x1bb   : > { %1784 = vmatpush.bf16.msra.mxu3 %v3408_v44  ;;  %v3864_v44 = vld [vmem:[%s6310_s4 + $0xec] sm:$0xf]  ;;  %v3363_v15 = vld [vmem:[%s6310_s4 + $0x108] sm:$0xf] }
 0x1bc   : > { %1714 = vmatpush.bf16.msrb.mxu0 %v3244_v9  ;;  %v3868_v12 = vld [vmem:[%s6310_s4 + $0x10c] sm:$0xf]  ;;  %v3235_v19 = vld [vmem:[%s6310_s4 + $0x8] sm:$0xf] }
 0x1bd   : > { %1759 = vmatpush.bf16.msra.mxu2 %v3296_v28  ;;  %v3348_v28 = vor.u32 %v3866_v47, %v3347_v45  ;;  %v3379_v47 = vld [vmem:[%s6310_s4 + $0x128] sm:$0xf]  ;;  %v3836_v13 = vld [vmem:[%s6310_s4 + $0xc] sm:$0xf] }
 0x1be   : > { %1739 = vmatpush.bf16.msrb.mxu1 %v3356_v56  ;;  %v3411_v56 = vld [vmem:[%s6310_s4 + $0x168] sm:$0xf] }
 0x1bf   : > { %1785 = vmatpush.bf16.msra.mxu3 %v3392_v27  ;;  %v3412_v9 = vor.u32 %v3882_v43, %v3411_v56 }
 0x1c0   : > { %3220 = vmatmul.msk.bf16.gmra.mxu2 %vm6315_vm0, %v4091_v32  ;;  %1715 = vmatpush.bf16.msrb.mxu0 %v3228_v4  ;;  %v3475_v32 = vld [vmem:[%s6310_s4 + $0x1e8] sm:$0xf] }
 0x1c1   : > { %1760 = vmatpush.bf16.msra.mxu2 %v3280_v1  ;;  %v3476_v18 = vor.u32 %v3898_v6, %v3475_v32  ;;  %v3333_v1 = vld [vmem:[%s6310_s4 + $0xd8] sm:$0xf0]  ;;  %v3395_v32 = vld [vmem:[%s6310_s4 + $0x148] sm:$0xf]  ;;  %v3878_v6 = vld [vmem:[%s6310_s4 + $0x154] sm:$0xf0] }
 0x1c2   : > { %v3336_v20 = vor.u32 %v3860_v24, %v3333_v1  ;;  %v3365_v24 = vld [vmem:[%s6310_s4 + $0x118] sm:$0xf0]  ;;  %v3842_v1 = vld [vmem:[%s6310_s4 + $0x34] sm:$0xf0] }
 0x1c3   : > { %1786 = vmatpush.bf16.msra.mxu3 %v3376_v31  ;;  %1828 = vmatpush.bf16.msra.mxu1 %v3476_v18  ;;  %v3886_v31 = vld [vmem:[%s6310_s4 + $0x194] sm:$0xf0]  ;;  %v3396_v18 = vor.u32 %v3878_v6, %v3395_v32 }
 0x1c4   : > { %1804 = vmatpush.bf16.msra.mxu0 %v3348_v28  ;;  %v3428_v49 = vor.u32 %v3886_v31, %v3427_v60  ;;  %v3872_v28 = vld [vmem:[%s6310_s4 + $0x12c] sm:$0xf]  ;;  %v3364_v60 = vor.u32 %v3870_v8, %v3363_v15 }
 0x1c5   : > { %1761 = vmatpush.bf16.msra.mxu2 %v3264_v26  ;;  %v3432_v26 = vor.u32 %v3884_v30, %v3429_v34  ;;  %v3840_v30 = vld [vmem:[%s6310_s4 + $0x2c] sm:$0xf]  ;;  %v3368_v34 = vor.u32 %v3868_v12, %v3365_v24 }
 0x1c7   : > { %1787 = vmatpush.bf16.msra.mxu3 %v3360_v3  ;;  %1829 = vmatpush.bf16.msra.mxu1 %v3460_v59  ;;  %v3413_v3 = vld [vmem:[%s6310_s4 + $0x178] sm:$0xf0] }
 0x1c8   : > { %1805 = vmatpush.bf16.msra.mxu0 %v3332_v25  ;;  %v3416_v0 = vor.u32 %v3880_v48, %v3413_v3  ;;  %v3285_v59 = vld [vmem:[%s6310_s4 + $0x78] sm:$0xf0]  ;;  %v3251_v25 = vld [vmem:[%s6310_s4 + $0x28] sm:$0xf]  ;;  %v3240_v3 = vor.u32 %v3836_v13, %v3237_v11 }
 0x1c9   : > { %1762 = vmatpush.bf16.msra.mxu2 %v3248_v16  ;;  %v3288_v45 = vor.u32 %v3848_v10, %v3285_v59  ;;  %v3252_v38 = vor.u32 %v3842_v1, %v3251_v25 }
 0x1ca   : > { %3224 = vmatmul.msk.bf16.gmra.mxu3 %vm6315_vm0, %v4092_v52 }
 0x1cb   : > { %1876 = vmatpush.bf16.msrb.mxu3 %v3480_v35  ;;  %1830 = vmatpush.bf16.msra.mxu1 %v3444_v61  ;;  %v3397_v35 = vld [vmem:[%s6310_s4 + $0x158] sm:$0xf0] }
 0x1cc   : > { %1806 = vmatpush.bf16.msra.mxu0 %v3316_v51  ;;  %v3400_v42 = vor.u32 %v3876_v40, %v3397_v35 }
 0x1cd   : > { %1763 = vmatpush.bf16.msra.mxu2 %v3232_v57  ;;  %v3301_v57 = vld [vmem:[%s6310_s4 + $0x98] sm:$0xf0] }
 0x1ce   : > { %v3304_v21 = vor.u32 %v3852_v22, %v3301_v57 }
 0x1cf   : > { %1877 = vmatpush.bf16.msrb.mxu3 %v3464_v63  ;;  %1831 = vmatpush.bf16.msra.mxu1 %v3428_v49  ;;  %v3874_v63 = vld [vmem:[%s6310_s4 + $0x134] sm:$0xf0]  ;;  %v3253_v49 = vld [vmem:[%s6310_s4 + $0x38] sm:$0xf0] }
 0x1d0   : > { %3221 = vmatmul.msk.bf16.gmra.mxu2 %vm6315_vm0, %v4092_v52  ;;  %v3349_v52 = vld [vmem:[%s6310_s4 + $0xf8] sm:$0xf0]  ;;  %1807 = vmatpush.bf16.msra.mxu0 %v3300_v39  ;;  %v3256_v51 = vor.u32 %v3840_v30, %v3253_v49 }
 0x1d1   : > { %v3352_v41 = vor.u32 %v3864_v44, %v3349_v52  ;;  %v3380_v44 = vor.u32 %v3874_v63, %v3379_v47  ;;  %v3381_v52 = vld [vmem:[%s6310_s4 + $0x138] sm:$0xf0] }
 0x1d3   : > { %1852 = vmatpush.bf16.msrb.mxu2 %v3352_v41  ;;  %1878 = vmatpush.bf16.msrb.mxu3 %v3448_v50  ;;  %v3846_v41 = vld [vmem:[%s6310_s4 + $0x54] sm:$0xf0]  ;;  %v3384_v50 = vor.u32 %v3872_v28, %v3381_v52 }
 0x1d4   : > { %1832 = vmatpush.bf16.msra.mxu1 %v3412_v9 }
 0x1d7   : > { %1853 = vmatpush.bf16.msrb.mxu2 %v3336_v20  ;;  %1879 = vmatpush.bf16.msrb.mxu3 %v3432_v26  ;;  %v3272_v20 = vor.u32 %v3844_v53, %v3269_v62  ;;  %v3838_v26 = vld [vmem:[%s6310_s4 + $0x14] sm:$0xf0] }
 0x1d8   : > { %1833 = vmatpush.bf16.msra.mxu1 %v3396_v18 }
 0x1db   : > { %1854 = vmatpush.bf16.msrb.mxu2 %v3320_v5  ;;  %1880 = vmatpush.bf16.msrb.mxu3 %v3416_v0  ;;  %v3236_v5 = vor.u32 %v3838_v26, %v3235_v19 }
 0x1dc   : > { %1834 = vmatpush.bf16.msra.mxu1 %v3380_v44 }
 0x1df   : > { %1855 = vmatpush.bf16.msrb.mxu2 %v3304_v21  ;;  %1881 = vmatpush.bf16.msrb.mxu3 %v3400_v42 }
 0x1e0   : > { %1835 = vmatpush.bf16.msra.mxu1 %v3364_v60 }
 0x1e3   : > { %1856 = vmatpush.bf16.msrb.mxu2 %v3288_v45  ;;  %1882 = vmatpush.bf16.msrb.mxu3 %v3384_v50 }
 0x1e7   : > { %1857 = vmatpush.bf16.msrb.mxu2 %v3272_v20  ;;  %1883 = vmatpush.bf16.msrb.mxu3 %v3368_v34 }
 0x1eb   : > { %1858 = vmatpush.bf16.msrb.mxu2 %v3256_v51 }
 0x1ef   : > { %1859 = vmatpush.bf16.msrb.mxu2 %v3240_v3 }
 0x22d   : > { %v1358_v33 = vpop.f32.mrf.mxu3 }
 0x233   : > { %v1334_v27 = vpop.f32.mrf.mxu2 }
 0x235   : > { %v1360_v7 = vpop.f32.mrf.mxu3 }
 0x236   : > { %v5275_v55 = vpack.c.bf16 %v1360_v7, %v1358_v33  ;;  %v3283_v33 = vld [vmem:[%s6310_s4 + $0x68] sm:$0xf] }
 0x237   : > { %v3284_v36 = vor.u32 %v3850_v37, %v3283_v33 }
 0x238   : > { %1740 = vmatmul.bf16.vlgmr.msrb.gmra.mxu1 %v5275_v55  ;;  %1788 = vmatmul.bf16.vlgmr.msra.gmra.mxu3 %v5275_v55 }
 0x239   : > { %1808 = vmatpush.bf16.msra.mxu0 %v3284_v36 }
 0x23b   : > { %v1336_v29 = vpop.f32.mrf.mxu2 }
 0x23c   : > { %v5315_v16 = vpack.c.bf16 %v1336_v29, %v1334_v27  ;;  %v3268_v27 = vor.u32 %v3846_v41, %v3267_v46 }
 0x23d   : > { %v1363_v4 = vpop.f32.mrf.mxu3 }
 0x23e   : > { %1716 = vmatmul.bf16.vlgmr.msrb.gmra.mxu0 %v5315_v16  ;;  %1764 = vmatmul.bf16.vlgmr.msra.gmra.mxu2 %v5315_v16 }
 0x23f   : > { %1809 = vmatpush.bf16.msra.mxu0 %v3268_v27 }
 0x243   : > { %v1339_v61 = vpop.f32.mrf.mxu2  ;;  %1810 = vmatpush.bf16.msra.mxu0 %v3252_v38 }
 0x245   : > { %v1365_v7 = vpop.f32.mrf.mxu3 }
 0x246   : > { %v1376_v31 = vpack.c.bf16 %v1365_v7, %v1363_v4  ;;  %v1324_v4 = vld [vmem:[%s6311_s5] sm:$0xf] }
 0x247   : > { %1811 = vmatpush.bf16.msra.mxu0 %v3236_v5  ;;  %v5422_v39 = vperm.slane %v1324_v4, 0  ;;  %v1381_v21 = vperm.slane %v1324_v4, 1  ;;  %v5455_v34 = vperm.slane %v1324_v4, 2 }
 0x248   : > { %1745 = vmatmul.bf16.gmra.mxu1 %v1376_v31  ;;  %1793 = vmatmul.bf16.gmra.mxu3 %v1376_v31 }
 0x24b   : > { %v1341_v56 = vpop.f32.mrf.mxu2 }
 0x24c   : > { %v1375_v43 = vpack.c.bf16 %v1341_v56, %v1339_v61 }
 0x24d   : > { %v1368_v48 = vpop.f32.mrf.mxu3 }
 0x24e   : > { %1721 = vmatmul.bf16.gmra.mxu0 %v1375_v43  ;;  %1769 = vmatmul.bf16.gmra.mxu2 %v1375_v43 }
 0x253   : > { %v1344_v9 = vpop.f32.mrf.mxu2 }
 0x255   : > { %v1370_v29 = vpop.f32.mrf.mxu3 }
 0x256   : > { %v1378_v0 = vpack.c.bf16 %v1370_v29, %v1368_v48 }
 0x258   : > { %1750 = vmatmul.bf16.gmra.mxu1 %v1378_v0  ;;  %1798 = vmatmul.bf16.gmra.mxu3 %v1378_v0 }
 0x25b   : > { %v1346_v23 = vpop.f32.mrf.mxu2 }
 0x25c   : > { %v1377_v17 = vpack.c.bf16 %v1346_v23, %v1344_v9 }
 0x25e   : > { %1726 = vmatmul.bf16.gmra.mxu0 %v1377_v17  ;;  %1774 = vmatmul.bf16.gmra.mxu2 %v1377_v17 }
 0x268   : > { %1836 = vmatmul.bf16.vlgmr.msra.gmra.mxu1 %v5275_v55  ;;  %1884 = vmatmul.bf16.vlgmr.msrb.gmra.mxu3 %v5275_v55 }
 0x26e   : > { %1812 = vmatmul.bf16.vlgmr.msra.gmra.mxu0 %v5315_v16  ;;  %1860 = vmatmul.bf16.vlgmr.msrb.gmra.mxu2 %v5315_v16 }
 0x278   : > { %1841 = vmatmul.bf16.gmra.mxu1 %v1376_v31  ;;  %1889 = vmatmul.bf16.gmra.mxu3 %v1376_v31 }
 0x27e   : > { %1817 = vmatmul.bf16.gmra.mxu0 %v1375_v43  ;;  %1865 = vmatmul.bf16.gmra.mxu2 %v1375_v43  ;;  %v5460_v43 = vperm.slane %v1324_v4, 3 }
 0x288   : > { %1846 = vmatmul.bf16.gmra.mxu1 %v1378_v0  ;;  %1894 = vmatmul.bf16.gmra.mxu3 %v1378_v0 }
 0x28e   : > { %1822 = vmatmul.bf16.gmra.mxu0 %v1377_v17  ;;  %1870 = vmatmul.bf16.gmra.mxu2 %v1377_v17 }
 0x2b5   : > { %v1741_v22 = vpop.f32.mrf.mxu1 }
 0x2bb   : > { %v1717_v55 = vpop.f32.mrf.mxu0  ;;  %v1789_v57 = vpop.f32.mrf.mxu3 }
 0x2bc   : > { %v1718_v32 = vadd.f32 %v1717_v55, %v5422_v39 }
 0x2bd   : > { %v5425_v16 = vpop.f32.mrf.mxu1 }
 0x2be   : > { %v5427_v6 = vadd.f32 %v1741_v22, %v1718_v32 }
 0x2c1   : > { %v1765_v18 = vpop.f32.mrf.mxu2 }
 0x2c2   : > { %v1766_v40 = vadd.f32 %v1765_v18, %v1381_v21 }
 0x2c3   : > { %v5429_v35 = vpop.f32.mrf.mxu0  ;;  %v1791_v33 = vpop.f32.mrf.mxu3 }
 0x2c4   : > { %v5431_v42 = vadd.f32 %v1789_v57, %v1766_v40 }
 0x2c5   : > { %v1746_v37 = vpop.f32.mrf.mxu1 }
 0x2c9   : > { %v1767_v10 = vpop.f32.mrf.mxu2 }
 0x2ca   : > { %v1768_v59 = vadd.f32 %v1767_v10, %v1381_v21 }
 0x2cb   : > { %v1722_v36 = vpop.f32.mrf.mxu0  ;;  %v1794_v45 = vpop.f32.mrf.mxu3 }
 0x2cc   : > { %v5433_v47 = vadd.f32 %v1791_v33, %v1768_v59  ;;  %v1723_v63 = vadd.f32 %v1722_v36, %v5422_v39 }
 0x2cd   : > { %v5436_v28 = vpop.f32.mrf.mxu1 }
 0x2ce   : > { %v5438_v44 = vadd.f32 %v1746_v37, %v1723_v63 }
 0x2d1   : > { %v1770_v52 = vpop.f32.mrf.mxu2 }
 0x2d2   : > { %v1771_v46 = vadd.f32 %v1770_v52, %v1381_v21 }
 0x2d3   : > { %v5440_v41 = vpop.f32.mrf.mxu0  ;;  %v1796_v53 = vpop.f32.mrf.mxu3 }
 0x2d4   : > { %v5442_v62 = vadd.f32 %v1794_v45, %v1771_v46 }
 0x2d5   : > { %v1751_v15 = vpop.f32.mrf.mxu1 }
 0x2d9   : > { %v1772_v61 = vpop.f32.mrf.mxu2 }
 0x2da   : > { %v1773_v50 = vadd.f32 %v1772_v61, %v1381_v21 }
 0x2db   : > { %v1727_v27 = vpop.f32.mrf.mxu0  ;;  %v1799_v8 = vpop.f32.mrf.mxu3 }
 0x2dc   : > { %v5444_v12 = vadd.f32 %v1796_v53, %v1773_v50  ;;  %v1728_v24 = vadd.f32 %v1727_v27, %v5422_v39 }
 0x2dd   : > { %v5447_v25 = vpop.f32.mrf.mxu1 }
 0x2de   : > { %v5449_v1 = vadd.f32 %v1751_v15, %v1728_v24 }
 0x2e1   : > { %v1775_v7 = vpop.f32.mrf.mxu2 }
 0x2e2   : > { %v1776_v20 = vadd.f32 %v1775_v7, %v1381_v21 }
 0x2e3   : > { %v5451_v60 = vpop.f32.mrf.mxu0  ;;  %v1801_v31 = vpop.f32.mrf.mxu3 }
 0x2e4   : > { %v5453_v30 = vadd.f32 %v1799_v8, %v1776_v20 }
 0x2e5   : > { %v1837_v49 = vpop.f32.mrf.mxu1 }
 0x2e9   : > { %v1777_v38 = vpop.f32.mrf.mxu2 }
 0x2ea   : > { %v1778_v19 = vadd.f32 %v1777_v38, %v1381_v21 }
 0x2eb   : > { %v1813_v26 = vpop.f32.mrf.mxu0  ;;  %v1885_v51 = vpop.f32.mrf.mxu3 }
 0x2ec   : > { %v5457_v13 = vadd.f32 %v1801_v31, %v1778_v19  ;;  %v1814_v11 = vadd.f32 %v1813_v26, %v5455_v34 }
 0x2ed   : > { %v1839_v56 = vpop.f32.mrf.mxu1 }
 0x2ee   : > { %v1838_v5 = vadd.f32 %v1837_v49, %v1814_v11 }
 0x2f0   : > { %v3481_v48 = vmul.f32 -1.442695, %v1838_v5 }
 0x2f1   : > { %v1861_v3 = vpop.f32.mrf.mxu2 }
 0x2f2   : > { %4026 = vpow2.f32 %v3481_v48  ;;  %v1862_v9 = vadd.f32 %v1861_v3, %v5460_v43  ;;  %v1720_v48 = vadd.f32 %v5429_v35, %v5422_v39 }
 0x2f3   : > { %v1815_v29 = vpop.f32.mrf.mxu0  ;;  %v1887_v0 = vpop.f32.mrf.mxu3 }
 0x2f4   : > { %v1816_v23 = vadd.f32 %v1815_v29, %v5455_v34  ;;  %v1886_v22 = vadd.f32 %v1885_v51, %v1862_v9  ;;  %v1725_v9 = vadd.f32 %v5440_v41, %v5422_v39  ;;  %v1730_v29 = vadd.f32 %v5451_v60, %v5422_v39 }
 0x2f5   : > { %v1842_v55 = vpop.f32.mrf.mxu1 }
 0x2f6   : > { %v1840_v17 = vadd.f32 %v1839_v56, %v1816_v23  ;;  %v3482_v40 = vmul.f32 -1.442695, %v1886_v22  ;;  %v5500_v39 = vadd.f32 %v5436_v28, %v1725_v9  ;;  %v5503_v60 = vadd.f32 %v5447_v25, %v1730_v29 }
 0x2f8   : > { %v4027_v57 = vpop.eup %4026  ;;  %v3483_v32 = vmul.f32 -1.442695, %v1840_v17 }
 0x2f9   : > { %v1863_v21 = vpop.f32.mrf.mxu2  ;;  %v5464_v18 = vadd.f32 1.0, %v4027_v57 }
 0x2fa   : > { %4028 = vpow2.f32 %v3483_v32  ;;  %v1864_v4 = vadd.f32 %v1863_v21, %v5460_v43 }
 0x2fb   : > { %v1818_v33 = vpop.f32.mrf.mxu0  ;;  %v1890_v59 = vpop.f32.mrf.mxu3  ;;  %4030 = vrcp.f32 %v5464_v18  ;;  %vm1953_vm3 = vweird.f32 %v5464_v18 }
 0x2fc   : > { %v1888_v37 = vadd.f32 %v1887_v0, %v1864_v4  ;;  %v1819_v10 = vadd.f32 %v1818_v33, %v5455_v34  ;;  %4032 = vpow2.f32 %v3482_v40  ;;  %v5497_v4 = vadd.f32 %v5425_v16, %v1720_v48 }
 0x2fd   : > { %v1844_v46 = vpop.f32.mrf.mxu1 }
 0x2fe   : > { %v1843_v36 = vadd.f32 %v1842_v55, %v1819_v10  ;;  %v3484_v45 = vmul.f32 -1.442695, %v1888_v37  ;;  %v1959_v10 = vand.u32 2147483648, %v5464_v18 }
 0x300   : > { %v4029_v63 = vpop.eup %4028  ;;  %v3485_v52 = vmul.f32 -1.442695, %v1843_v36 }
 0x301   : > { %v1866_v53 = vpop.f32.mrf.mxu2  ;;  %v5470_v61 = vadd.f32 1.0, %v4029_v63  ;;  %v5472_v27 = vpop.eup %4030 }
 0x302   : > { %4034 = vpow2.f32 %v3485_v52  ;;  %v1867_v15 = vadd.f32 %v1866_v53, %v5460_v43  ;;  %v4033_v7 = vpop.eup %4032  ;;  %v1949_v49 = vmul.f32 %v5472_v27, %v5464_v18  ;;  %vm1954_vm7 = vweird.f32 %v5472_v27 }
 0x303   : > { %4036 = vpow2.f32 %v3484_v45  ;;  %v1820_v50 = vpop.f32.mrf.mxu0  ;;  %v1892_v38 = vpop.f32.mrf.mxu3  ;;  %v5478_v26 = vadd.f32 1.0, %v4033_v7  ;;  %v1989_v53 = vand.u32 2147483648, %v5470_v61  ;;  %vm5541_vm10 = vmor %vm1953_vm3, %vm1954_vm7  ;;  %vm1983_vm11 = vweird.f32 %v5470_v61 }
 0x304   : > { %v1891_v8 = vadd.f32 %v1890_v59, %v1867_v15  ;;  %v1821_v24 = vadd.f32 %v1820_v50, %v5455_v34  ;;  %4038 = vrcp.f32 %v5470_v61  ;;  %v1950_v17 = vsub.f32 1.0, %v1949_v49 }
 0x305   : > { %v1847_v0 = vpop.f32.mrf.mxu1  ;;  %v5546_v9 = vor.u32 1.1754944e-38, %v1989_v53 }
 0x306   : > { %v3486_v20 = vmul.f32 -1.442695, %v1891_v8  ;;  %v1845_v31 = vadd.f32 %v1844_v46, %v1821_v24  ;;  %v1951_v40 = vmul.f32 %v5472_v27, %v1950_v17  ;;  %v1974_v8 = vand.u32 2147483648, %v5478_v26 }
 0x308   : > { %v4035_v19 = vpop.eup %4034  ;;  %4040 = vpow2.f32 %v3486_v20  ;;  %v3487_v51 = vmul.f32 -1.442695, %v1845_v31  ;;  %v5524_v50 = vadd.f32 %v5472_v27, %v1951_v40  ;;  %v5531_v31 = vor.u32 1.1754944e-38, %v1959_v10 }
 0x309   : > { %v4037_v11 = vpop.eup %4036  ;;  %v5480_v56 = vadd.f32 1.0, %v4035_v19  ;;  %v1868_v5 = vpop.f32.mrf.mxu2 }
 0x30a   : > { %4042 = vpow2.f32 %v3487_v51  ;;  %v1869_v3 = vadd.f32 %v1868_v5, %v5460_v43  ;;  %v5491_v22 = vadd.f32 1.0, %v4037_v11  ;;  %v5494_v57 = vpop.eup %4038  ;;  %v1972_v51 = vand.u32 2147483647, %v5478_v26 }
 0x30b   : > { %4044 = vrcp.f32 %v5480_v56  ;;  %v1823_v23 = vpop.f32.mrf.mxu0  ;;  %v1979_v16 = vmul.f32 %v5494_v57, %v5470_v61  ;;  %v1895_v25 = vpop.f32.mrf.mxu3  ;;  %v2017_v10 = vand.u32 2147483647, %v5480_v56  ;;  %vm2013_vm9 = vweird.f32 %v5480_v56 }
 0x30c   : > { %4046 = vrcp.f32 %v5478_v26  ;;  %v1893_v55 = vadd.f32 %v1892_v38, %v1869_v3  ;;  %v1824_v35 = vadd.f32 %v1823_v23, %v5455_v34  ;;  %v5552_v23 = vor.u32 1.1754944e-38, %v1974_v8 }
 0x30d   : > { %4048 = vrcp.f32 %v5491_v22  ;;  %v1849_v38 = vpop.f32.mrf.mxu1  ;;  %v1980_v19 = vsub.f32 1.0, %v1979_v16  ;;  %v2002_v17 = vand.u32 2147483647, %v5491_v22  ;;  %vm1984_vm12 = vweird.f32 %v5494_v57 }
 0x30e   : > { %v4041_v32 = vpop.eup %4040  ;;  %v3488_v21 = vmul.f32 -1.442695, %v1893_v55  ;;  %v1848_v41 = vadd.f32 %v1847_v0, %v1824_v35  ;;  %vm5592_vm2 = vcmp.eq.f32.partialorder %v2017_v10, 8.507059e+37  ;;  %vm5616_vm5 = vmor %vm1983_vm11, %vm1984_vm12 }
 0x30f   : > { %v5513_v28 = vadd.f32 1.0, %v4041_v32  ;;  %v1981_v16 = vmul.f32 %v5494_v57, %v1980_v19 }
 0x310   : > { %v4043_v33 = vpop.eup %4042  ;;  %v3489_v37 = vmul.f32 -1.442695, %v1848_v41  ;;  %4050 = vpow2.f32 %v3488_v21  ;;  %v2019_v41 = vand.u32 2147483648, %v5480_v56 }
 0x311   : > { %v5509_v59 = vpop.eup %4044  ;;  %v5515_v36 = vadd.f32 1.0, %v4043_v33  ;;  %v1871_v45 = vpop.f32.mrf.mxu2  ;;  %v1982_v19 = vadd.f32 %v5494_v57, %v1981_v16  ;;  %vm2028_vm11 = vweird.f32 %v5513_v28 }
 0x312   : > { %v5517_v63 = vpop.eup %4046  ;;  %4052 = vpow2.f32 %v3489_v37  ;;  %v1872_v52 = vadd.f32 %v1871_v45, %v5460_v43  ;;  %v2009_v24 = vmul.f32 %v5509_v59, %v5480_v56  ;;  %vm2014_vm14 = vweird.f32 %v5509_v59 }
 0x313   : > { %4054 = vrcp.f32 %v5515_v36  ;;  %v1825_v15 = vpop.f32.mrf.mxu0  ;;  %v1964_v49 = vmul.f32 %v5517_v63, %v5478_v26  ;;  %v5537_v11 = vpop.eup %4048  ;;  %v2047_v16 = vand.u32 2147483647, %v5515_v36  ;;  %vm2043_vm8 = vweird.f32 %v5515_v36  ;;  %vm5632_vm1 = vmor %vm2013_vm9, %vm2014_vm14 }
 0x314   : > { %v1896_v7 = vadd.f32 %v1895_v25, %v1872_v52  ;;  %v1826_v20 = vadd.f32 %v1825_v15, %v5455_v34  ;;  %4056 = vrcp.f32 %v5513_v28  ;;  %v1987_v34 = vand.u32 2147483647, %v5470_v61 }
 0x315   : > { %v2010_v21 = vsub.f32 1.0, %v2009_v24  ;;  %v1965_v25 = vsub.f32 1.0, %v1964_v49  ;;  %v5573_v8 = vmul.f32 %v5537_v11, %v5491_v22  ;;  %v1897_v24 = vpop.f32.mrf.mxu3  ;;  %v2020_v49 = vor.u32 1.1754944e-38, %v2019_v41 }
 0x316   : > { %v3490_v5 = vmul.f32 -1.442695, %v1896_v7  ;;  %v1850_v48 = vadd.f32 %v1849_v38, %v1826_v20  ;;  %v4051_v29 = vpop.eup %4050  ;;  %vm5579_vm6 = vcmp.eq.f32.partialorder %v1987_v34, 8.507059e+37  ;;  %vm5636_vm15 = vcmp.eq.f32.partialorder %v2047_v16, 8.507059e+37 }
 0x317   : > { %v5566_v52 = vadd.f32 1.0, %v4051_v29  ;;  %v2011_v20 = vmul.f32 %v5509_v59, %v2010_v21  ;;  %v5587_v29 = vmul.f32 %v5517_v63, %v1965_v25  ;;  %v2049_v25 = vand.u32 2147483648, %v5515_v36 }
 0x318   : > { %v4053_v35 = vpop.eup %4052  ;;  %4058 = vpow2.f32 %v3490_v5  ;;  %v3491_v32 = vmul.f32 -1.442695, %v1850_v48  ;;  %v2032_v5 = vand.u32 2147483647, %v5513_v28  ;;  %v2034_v48 = vand.u32 2147483648, %v5513_v28 }
 0x319   : > { %v5558_v40 = vpop.eup %4054  ;;  %v5560_v33 = vadd.f32 1.0, %v4053_v35  ;;  %v1873_v37 = vpop.f32.mrf.mxu2  ;;  %v2012_v10 = vadd.f32 %v5509_v59, %v2011_v20  ;;  %vm1969_vm9 = vweird.f32 %v5517_v63 }
 0x31a   : > { %v2039_v45 = vmul.f32 %v5558_v40, %v5515_v36  ;;  %4060 = vpow2.f32 %v3491_v32  ;;  %v1874_v53 = vadd.f32 %v1873_v37, %v5460_v43  ;;  %v5569_v15 = vpop.eup %4056  ;;  %vm2044_vm4 = vweird.f32 %v5558_v40 }
 0x31b   : > { %4062 = vrcp.f32 %v5560_v33  ;;  %v2024_v32 = vmul.f32 %v5569_v15, %v5513_v28  ;;  %vm2073_vm13 = vweird.f32 %v5560_v33  ;;  %v2050_v36 = vor.u32 1.1754944e-38, %v2049_v25  ;;  %vm5651_vm7 = vmor %vm2043_vm8, %vm2044_vm4 }
 0x31c   : > { %v1898_v7 = vadd.f32 %v1897_v24, %v1874_v53  ;;  %v2040_v38 = vsub.f32 1.0, %v2039_v45  ;;  %4064 = vrcp.f32 %v5566_v52  ;;  %v2077_v53 = vand.u32 2147483647, %v5560_v33 }
 0x31d   : > { %v2079_v24 = vand.u32 2147483648, %v5560_v33  ;;  %v2016_v56 = vsel %vm5632_vm1, %v5509_v59, %v2012_v10  ;;  %vm2029_vm12 = vweird.f32 %v5569_v15  ;;  %vm1968_vm4 = vweird.f32 %v5478_v26  ;;  %v3959_v26 = vld [vmem:[%s6312_s6 + $0x1e4] sm:$0xf] }
 0x31e   : > { %v4059_v35 = vpop.eup %4058  ;;  %v3492_v21 = vmul.f32 -1.442695, %v1898_v7  ;;  %v2041_v41 = vmul.f32 %v5558_v40, %v2040_v38  ;;  %vm5642_vm3 = vcmp.eq.f32.partialorder %v2077_v53, 8.507059e+37  ;;  %v5680_v43 = vsel %vm5592_vm2, %v2020_v49, %v2016_v56 }
 0x31f   : > { %v5597_v37 = vadd.f32 1.0, %v4059_v35 }
 0x320   : > { %v4061_v45 = vpop.eup %4060  ;;  %4066 = vpow2.f32 %v3492_v21  ;;  %v2042_v35 = vadd.f32 %v5558_v40, %v2041_v41  ;;  %v2025_v41 = vsub.f32 1.0, %v2024_v32  ;;  %v2080_v32 = vor.u32 1.1754944e-38, %v2079_v24 }
 0x321   : > { %v5605_v7 = vpop.eup %4062  ;;  %4068 = vrcp.f32 %v5597_v37  ;;  %v5608_v38 = vadd.f32 1.0, %v4061_v45  ;;  %v1986_v45 = vsel %vm5616_vm5, %v5494_v57, %v1982_v19  ;;  %v2092_v56 = vand.u32 2147483647, %v5597_v37 }
 0x322   : > { %v2069_v20 = vmul.f32 %v5605_v7, %v5560_v33  ;;  %v5640_v21 = vpop.eup %4064  ;;  %v2046_v53 = vsel %vm5651_vm7, %v5558_v40, %v2042_v35  ;;  %v5664_v59 = vsel %vm5579_vm6, %v5546_v9, %v1986_v45  ;;  %vm2074_vm14 = vweird.f32 %v5605_v7 }
 0x323   : > { %4070 = vrcp.f32 %v5608_v38  ;;  %v2109_v25 = vand.u32 2147483648, %v5608_v38  ;;  %v2026_v61 = vmul.f32 %v5569_v15, %v2025_v41  ;;  %v2054_v40 = vmul.f32 %v5640_v21, %v5566_v52  ;;  %vm5694_vm2 = vmor %vm2073_vm13, %vm2074_vm14 }
 0x324   : > { %v2070_v57 = vsub.f32 1.0, %v2069_v20  ;;  %v2107_v20 = vand.u32 2147483647, %v5608_v38  ;;  %v2094_v35 = vand.u32 2147483648, %v5597_v37  ;;  %vm2088_vm6 = vweird.f32 %v5597_v37  ;;  %vm5730_vm14 = vmor %vm2028_vm11, %vm2029_vm12 }
 0x325   : > { %vm2103_vm5 = vweird.f32 %v5608_v38  ;;  %v2110_v34 = vor.u32 1.1754944e-38, %v2109_v25  ;;  %v2027_v33 = vadd.f32 %v5569_v15, %v2026_v61  ;;  %vm5714_vm13 = vcmp.eq.f32.partialorder %v2032_v5, 8.507059e+37  ;;  %vm5759_vm12 = vmor %vm1968_vm4, %vm1969_vm9 }
 0x326   : > { %v4067_v24 = vpop.eup %4066  ;;  %v2071_v10 = vmul.f32 %v5605_v7, %v2070_v57  ;;  %v2051_v57 = vsel %vm5636_vm15, %v2050_v36, %v2046_v53  ;;  %vm5704_vm8 = vcmp.eq.f32.partialorder %v2107_v20, 8.507059e+37  ;;  %v2095_v46 = vor.u32 1.1754944e-38, %v2094_v35 }
 0x327   : > { %v5672_v16 = vpop.eup %4068  ;;  %v5676_v9 = vadd.f32 1.0, %v4067_v24  ;;  %v2062_v35 = vand.u32 2147483647, %v5566_v52  ;;  %vm5743_vm0 = vcmp.eq.f32.partialorder %v2092_v56, 8.507059e+37  ;;  %vm2059_vm11 = vweird.f32 %v5640_v21 }
 0x328   : > { %v2084_v45 = vmul.f32 %v5672_v16, %v5597_v37  ;;  %v2072_v41 = vadd.f32 %v5605_v7, %v2071_v10  ;;  %v5710_v10 = vmul.f32 %v2051_v57, %v5500_v39  ;;  %vm2089_vm15 = vweird.f32 %v5672_v16 }
 0x329   : > { %v4071_v55 = vpop.eup %4070  ;;  %4072 = vrcp.f32 %v5676_v9  ;;  %v2122_v39 = vand.u32 2147483647, %v5676_v9  ;;  %v2064_v57 = vand.u32 2147483648, %v5566_v52  ;;  %vm5776_vm9 = vmor %vm2088_vm6, %vm2089_vm15  ;;  %vm2058_vm6 = vweird.f32 %v5566_v52 }
 0x32a   : > { %v2085_v0 = vsub.f32 1.0, %v2084_v45  ;;  %v2099_v36 = vmul.f32 %v4071_v55, %v5608_v38  ;;  %v2076_v53 = vsel %vm5694_vm2, %v5605_v7, %v2072_v41  ;;  %v2035_v45 = vor.u32 1.1754944e-38, %v2034_v48  ;;  %vm2060_vm1 = vmor %vm2058_vm6, %vm2059_vm11 }
 0x32b   : > { %v2081_v61 = vsel %vm5642_vm3, %v2080_v32, %v2076_v53  ;;  %vm2104_vm7 = vweird.f32 %v4071_v55  ;;  %v2055_v48 = vsub.f32 1.0, %v2054_v40  ;;  %vm5737_vm2 = vcmp.eq.f32.partialorder %v1972_v51, 8.507059e+37 }
 0x32c   : > { %v2100_v7 = vsub.f32 1.0, %v2099_v36  ;;  %v2086_v20 = vmul.f32 %v5672_v16, %v2085_v0  ;;  %v2031_v40 = vsel %vm5730_vm14, %v5569_v15, %v2027_v33  ;;  %v1967_v0 = vadd.f32 %v5517_v63, %v5587_v29  ;;  %vm2105_vm3 = vmor %vm2103_vm5, %vm2104_vm7  ;;  %v3599_v36 = vld [vmem:[%s6312_s6 + $0xd0] sm:$0xf0] }
 0x32d   : > { %v2056_v51 = vmul.f32 %v5640_v21, %v2055_v48  ;;  %v1995_v15 = vsub.f32 1.0, %v5573_v8  ;;  %vm5766_vm14 = vcmp.eq.f32.partialorder %v2002_v17, 8.507059e+37  ;;  %v2136_v29 = vmul.f32 %v2081_v61, %v5449_v1 }
 0x32e   : > { %v2101_v19 = vmul.f32 %v4071_v55, %v2100_v7  ;;  %v2087_v32 = vadd.f32 %v5672_v16, %v2086_v20  ;;  %v2124_v8 = vand.u32 2147483648, %v5676_v9  ;;  %v6382_v17 = vand.u32 2147483647, %v5464_v18 }
 0x32f   : > { %v4073_v49 = vpop.eup %4072  ;;  %v2036_v1 = vsel %vm5714_vm13, %v2035_v45, %v2031_v40  ;;  %v2057_v37 = vadd.f32 %v5640_v21, %v2056_v51  ;;  %vm2063_vm15 = vcmp.eq.f32.partialorder %v2062_v35, 8.507059e+37  ;;  %v2065_v5 = vor.u32 1.1754944e-38, %v2064_v57 }
 0x330   : > { %v2114_v53 = vmul.f32 %v4073_v49, %v5676_v9  ;;  %v2102_v33 = vadd.f32 %v4071_v55, %v2101_v19  ;;  %vm5783_vm4 = vcmp.eq.f32.partialorder %v6382_v17, 8.507059e+37  ;;  %v2091_v18 = vsel %vm5776_vm9, %v5672_v16, %v2087_v32 }
 0x331   : > { %v2061_v25 = vsel %vm2060_vm1, %v5640_v21, %v2057_v37  ;;  %v1971_v52 = vsel %vm5759_vm12, %v5517_v63, %v1967_v0  ;;  %v1996_v45 = vmul.f32 %v5537_v11, %v1995_v15  ;;  %vm2119_vm5 = vweird.f32 %v4073_v49  ;;  %v3925_v0 = vld [vmem:[%s6312_s6 + $0xcc] sm:$0xf0]  ;;  %v3923_v15 = vld [vmem:[%s6312_s6 + $0xc4] sm:$0xf]  ;;  %v3581_v37 = vld [vmem:[%s6312_s6 + $0xa0] sm:$0xf] }
 0x332   : > { %v2115_v20 = vsub.f32 1.0, %v2114_v53  ;;  %v2106_v61 = vsel %vm2105_vm3, %v4071_v55, %v2102_v33  ;;  %v2066_v16 = vsel %vm2063_vm15, %v2065_v5, %v2061_v25  ;;  %vm2118_vm13 = vweird.f32 %v5676_v9  ;;  %v3741_v53 = vld [vmem:[%s6312_s6 + $0x1e0] sm:$0xf] }
 0x333   : > { %v2111_v38 = vsel %vm5704_vm8, %v2110_v34, %v2106_v61  ;;  %v5809_v35 = vmul.f32 %v2036_v1, %v5442_v62  ;;  %v5812_v34 = vmul.f32 %v2066_v16, %v5444_v12  ;;  %v1997_v21 = vadd.f32 %v5537_v11, %v1996_v45  ;;  %vm2120_vm3 = vmor %vm2118_vm13, %vm2119_vm5  ;;  %v3919_v61 = vld [vmem:[%s6312_s6 + $0xa4] sm:$0xf]  ;;  %v3725_v5 = vld [vmem:[%s6312_s6 + $0x1c0] sm:$0xf] }
 0x334   : > { %v2138_v55 = vmul.f32 %v2111_v38, %v5503_v60  ;;  %v2116_v48 = vmul.f32 %v4073_v49, %v2115_v20  ;;  %v1976_v63 = vsel %vm5737_vm2, %v5552_v23, %v1971_v52  ;;  %vm6385_vm8 = vweird.f32 %v5537_v11  ;;  %v3921_v20 = vld [vmem:[%s6312_s6 + $0xac] sm:$0xf0]  ;;  %v3955_v52 = vld [vmem:[%s6312_s6 + $0x1c4] sm:$0xf]  ;;  %v3727_v45 = vld [vmem:[%s6312_s6 + $0x1d0] sm:$0xf0] }
 0x335   : > { %vm6386_vm1 = vweird.f32 %v5491_v22  ;;  %v6387_v60 = vand.u32 2147483648, %v5491_v22  ;;  %v2096_v12 = vsel %vm5743_vm0, %v2095_v46, %v2091_v18  ;;  %v2125_v9 = vor.u32 1.1754944e-38, %v2124_v8  ;;  %v3743_v8 = vld [vmem:[%s6312_s6 + $0x1f0] sm:$0xf0]  ;;  %v3957_v38 = vld [vmem:[%s6312_s6 + $0x1cc] sm:$0xf0] }
 0x336   : > { %v2148_v24 = vpack.c.bf16 %v2138_v55, %v2136_v29  ;;  %v2117_v19 = vadd.f32 %v4073_v49, %v2116_v48  ;;  %vm2000_vm7 = vmor %vm6386_vm1, %vm6385_vm8  ;;  %v2147_v32 = vpack.c.bf16 %v5812_v34, %v5809_v35  ;;  %v5831_v23 = vmul.f32 %v5680_v43, %v5438_v44  ;;  %v3961_v29 = vld [vmem:[%s6312_s6 + $0x1ec] sm:$0xf0]  ;;  %v3583_v18 = vld [vmem:[%s6312_s6 + $0xb0] sm:$0xf0] }
 0x337   : > { %v2005_v62 = vor.u32 1.1754944e-38, %v6387_v60  ;;  %v2001_v40 = vsel %vm2000_vm7, %v5537_v11, %v1997_v21  ;;  %vm2123_vm2 = vcmp.eq.f32.partialorder %v2122_v39, 8.507059e+37  ;;  %v6388_v46 = vsel %vm5541_vm10, %v5472_v27, %v5524_v50  ;;  %v3565_v16 = vld [vmem:[%s6312_s6 + $0x80] sm:$0xf]  ;;  %v3917_v21 = vld [vmem:[%s6312_s6 + $0x8c] sm:$0xf0] }
 0x338   : > { %2220 = vmatpush.bf16.msrb.mxu0 %v2148_v24  ;;  %v2121_v41 = vsel %vm2120_vm3, %v4073_v49, %v2117_v19  ;;  %v1961_v11 = vsel %vm5783_vm4, %v5531_v31, %v6388_v46  ;;  %v2129_v28 = vmul.f32 %v1976_v63, %v5431_v42  ;;  %v2146_v43 = vpack.c.bf16 %v5710_v10, %v5831_v23  ;;  %v4093_v42 = vld [vmem:[%s6307_s1] sm:$0xff]  ;;  %v3953_v63 = vld [vmem:[%s6312_s6 + $0x1ac] sm:$0xf0] }
 0x339   : > { %v2006_v22 = vsel %vm5766_vm14, %v2005_v62, %v2001_v40  ;;  %v2126_v57 = vsel %vm2123_vm2, %v2125_v9, %v2121_v41  ;;  %v2137_v39 = vmul.f32 %v2096_v12, %v5453_v30  ;;  %v2130_v3 = vmul.f32 %v5664_v59, %v5497_v4  ;;  %v3927_v30 = vld [vmem:[%s6312_s6 + $0xe4] sm:$0xf]  ;;  %v3615_v4 = vld [vmem:[%s6312_s6 + $0xf0] sm:$0xf0]  ;;  %v3597_v59 = vld [vmem:[%s6312_s6 + $0xc0] sm:$0xf] }
 0x33a   : > { %v2131_v44 = vmul.f32 %v2006_v22, %v5433_v47  ;;  %v2139_v49 = vmul.f32 %v2126_v57, %v5457_v13  ;;  %v2128_v50 = vmul.f32 %v1961_v11, %v5427_v6  ;;  %vm6389_vm0 = vcmask 392192   ;;  %v3613_v47 = vld [vmem:[%s6312_s6 + $0xe0] sm:$0xf]  ;;  %v3929_v6 = vld [vmem:[%s6312_s6 + $0xec] sm:$0xf0] }
 0x33b   : > { %vm6390_vm10 = vmmov %vm6389_vm0  ;;  %v3614_v13 = vor.u32 %v3929_v6, %v3613_v47  ;;  %v3618_v56 = vor.u32 %v3927_v30, %v3615_v4  ;;  %v3598_v33 = vor.u32 %v3925_v0, %v3597_v59  ;;  %v3602_v17 = vor.u32 %v3923_v15, %v3599_v36  ;;  %v3709_v19 = vld [vmem:[%s6312_s6 + $0x1a0] sm:$0xf]  ;;  %v3951_v60 = vld [vmem:[%s6312_s6 + $0x1a4] sm:$0xf] }
 0x33c   : > { %v2145_v51 = vpack.c.bf16 %v2131_v44, %v2129_v28  ;;  %2221 = vmatpush.bf16.msrb.mxu0 %v2146_v43  ;;  %v2149_v27 = vpack.c.bf16 %v2139_v49, %v2137_v39  ;;  %v2144_v31 = vpack.c.bf16 %v2130_v3, %v2128_v50  ;;  %v3742_v7 = vor.u32 %v3961_v29, %v3741_v53  ;;  %v3915_v62 = vld [vmem:[%s6312_s6 + $0x84] sm:$0xf]  ;;  %v3567_v12 = vld [vmem:[%s6312_s6 + $0x90] sm:$0xf0]  ;;  %vm6391_vm11 = vmmov %vm6389_vm0 }
 0x33d   : > { %2598 = vmatpush.bf16.msra.mxu2 %v3614_v13  ;;  %v3746_v1 = vor.u32 %v3959_v26, %v3743_v8  ;;  %v3726_v25 = vor.u32 %v3957_v38, %v3725_v5  ;;  %v3582_v55 = vor.u32 %v3921_v20, %v3581_v37  ;;  %v3730_v48 = vor.u32 %v3955_v52, %v3727_v45  ;;  %v3711_v9 = vld [vmem:[%s6312_s6 + $0x1b0] sm:$0xf0]  ;;  %v3549_v57 = vld [vmem:[%s6312_s6 + $0x60] sm:$0xf]  ;;  %v3949_v11 = vld [vmem:[%s6312_s6 + $0x18c] sm:$0xf0] }
 0x33e   : > { %2244 = vmatpush.bf16.msrb.mxu1 %v2149_v27  ;;  %2618 = vmatpush.bf16.msra.mxu3 %v3742_v7  ;;  %v3586_v24 = vor.u32 %v3919_v61, %v3583_v18  ;;  %v3710_v40 = vor.u32 %v3953_v63, %v3709_v19  ;;  %v3566_v41 = vor.u32 %v3917_v21, %v3565_v16  ;;  %v3693_v46 = vld [vmem:[%s6312_s6 + $0x180] sm:$0xf]  ;;  %v3913_v44 = vld [vmem:[%s6312_s6 + $0x6c] sm:$0xf0]  ;;  %v3947_v43 = vld [vmem:[%s6312_s6 + $0x184] sm:$0xf] }
 0x33f   : > { %v3714_v22 = vor.u32 %v3951_v60, %v3711_v9  ;;  %v3570_v28 = vor.u32 %v3915_v62, %v3567_v12  ;;  %v3695_v39 = vld [vmem:[%s6312_s6 + $0x190] sm:$0xf0]  ;;  %v3911_v49 = vld [vmem:[%s6312_s6 + $0x64] sm:$0xf]  ;;  %v3550_v27 = vor.u32 %v3913_v44, %v3549_v57  ;;  %vm6392_vm12 = vmmov %vm6389_vm0 }
 0x340   : > { %2222 = vmatpush.bf16.msrb.mxu0 %v2144_v31  ;;  %v3551_v3 = vld [vmem:[%s6312_s6 + $0x70] sm:$0xf0]  ;;  %v3698_v50 = vor.u32 %v3947_v43, %v3695_v39  ;;  %vm6393_vm14 = vmmov %vm6389_vm0  ;;  %v3533_v47 = vld [vmem:[%s6312_s6 + $0x40] sm:$0xf] }
 0x341   : > { %2599 = vmatpush.bf16.msra.mxu2 %v3598_v33  ;;  %v3554_v31 = vor.u32 %v3911_v49, %v3551_v3  ;;  %vm6394_vm9 = vmmov %vm6389_vm0  ;;  %v3909_v6 = vld [vmem:[%s6312_s6 + $0x4c] sm:$0xf0]  ;;  %v3907_v30 = vld [vmem:[%s6312_s6 + $0x44] sm:$0xf] }
 0x342   : > { %2245 = vmatpush.bf16.msrb.mxu1 %v2147_v32  ;;  %v4094_v32 = vld [vmem:[%s6307_s1 + $0x8] sm:$0xff]  ;;  %2619 = vmatpush.bf16.msra.mxu3 %v3726_v25  ;;  %v3534_v13 = vor.u32 %v3909_v6, %v3533_v47  ;;  %v3535_v4 = vld [vmem:[%s6312_s6 + $0x50] sm:$0xf0]  ;;  %v3677_v59 = vld [vmem:[%s6312_s6 + $0x160] sm:$0xf] }
 0x343   : > { %3493 = vmatmul.msk.bf16.vlgmr.msrb.gmra.mxu0 %vm6389_vm0, %v4093_v42  ;;  %v3945_v0 = vld [vmem:[%s6312_s6 + $0x16c] sm:$0xf0]  ;;  %v3943_v36 = vld [vmem:[%s6312_s6 + $0x164] sm:$0xf]  ;;  %v3679_v53 = vld [vmem:[%s6312_s6 + $0x170] sm:$0xf0] }
 0x344   : > { %2638 = vmatpush.bf16.msra.mxu0 %v3618_v56  ;;  %v3538_v56 = vor.u32 %v3907_v30, %v3535_v4  ;;  %v3678_v15 = vor.u32 %v3945_v0, %v3677_v59  ;;  %v3517_v33 = vld [vmem:[%s6312_s6 + $0x20] sm:$0xf]  ;;  %v3682_v29 = vor.u32 %v3943_v36, %v3679_v53  ;;  %v3905_v26 = vld [vmem:[%s6312_s6 + $0x2c] sm:$0xf0]  ;;  %v3903_v8 = vld [vmem:[%s6312_s6 + $0x24] sm:$0xf] }
 0x345   : > { %2600 = vmatpush.bf16.msra.mxu2 %v3582_v55  ;;  %v3518_v7 = vor.u32 %v3905_v26, %v3517_v33  ;;  %v3661_v37 = vld [vmem:[%s6312_s6 + $0x140] sm:$0xf]  ;;  %v3941_v20 = vld [vmem:[%s6312_s6 + $0x14c] sm:$0xf0]  ;;  %v3939_v61 = vld [vmem:[%s6312_s6 + $0x144] sm:$0xf] }
 0x346   : > { %2246 = vmatpush.bf16.msrb.mxu1 %v2145_v51  ;;  %2620 = vmatpush.bf16.msra.mxu3 %v3710_v40  ;;  %v3694_v51 = vor.u32 %v3949_v11, %v3693_v46  ;;  %v3662_v18 = vor.u32 %v3941_v20, %v3661_v37  ;;  %v3663_v5 = vld [vmem:[%s6312_s6 + $0x150] sm:$0xf0]  ;;  %v3501_v25 = vld [vmem:[%s6312_s6] sm:$0xf]  ;;  %v3901_v52 = vld [vmem:[%s6312_s6 + $0xc] sm:$0xf0] }
 0x347   : > { %v3666_v38 = vor.u32 %v3939_v61, %v3663_v5  ;;  %v3899_v45 = vld [vmem:[%s6312_s6 + $0x4] sm:$0xf]  ;;  %v3502_v55 = vor.u32 %v3901_v52, %v3501_v25  ;;  %v3645_v16 = vld [vmem:[%s6312_s6 + $0x120] sm:$0xf]  ;;  %v3937_v21 = vld [vmem:[%s6312_s6 + $0x12c] sm:$0xf0] }
 0x348   : > { %2639 = vmatpush.bf16.msra.mxu0 %v3602_v17  ;;  %v3519_v17 = vld [vmem:[%s6312_s6 + $0x30] sm:$0xf0]  ;;  %v3646_v19 = vor.u32 %v3937_v21, %v3645_v16  ;;  %v3935_v63 = vld [vmem:[%s6312_s6 + $0x124] sm:$0xf]  ;;  %v3629_v12 = vld [vmem:[%s6312_s6 + $0x100] sm:$0xf] }
 0x349   : > { %3496 = vmatmul.msk.bf16.vlgmr.msrb.gmra.mxu1 %vm6390_vm10, %v4093_v42  ;;  %2601 = vmatpush.bf16.msra.mxu2 %v3566_v41  ;;  %v4095_v42 = vld [vmem:[%s6307_s1 + $0x10] sm:$0xff]  ;;  %v3621_v57 = vld [vmem:[%s6312_s6 + $0xe8] sm:$0xf]  ;;  %v3930_v46 = vld [vmem:[%s6312_s6 + $0xf4] sm:$0xf0] }
 0x34a   : > { %2658 = vmatpush.bf16.msra.mxu1 %v3746_v1  ;;  %2621 = vmatpush.bf16.msra.mxu3 %v3694_v51  ;;  %v3522_v1 = vor.u32 %v3903_v8, %v3519_v17  ;;  %v3647_v60 = vld [vmem:[%s6312_s6 + $0x130] sm:$0xf0]  ;;  %v3933_v9 = vld [vmem:[%s6312_s6 + $0x10c] sm:$0xf0]  ;;  %v3928_v11 = vld [vmem:[%s6312_s6 + $0xec] sm:$0xf] }
 0x34b   : > { %v3650_v62 = vor.u32 %v3935_v63, %v3647_v60  ;;  %v3630_v40 = vor.u32 %v3933_v9, %v3629_v12  ;;  %v3631_v41 = vld [vmem:[%s6312_s6 + $0x110] sm:$0xf0]  ;;  %v3623_v44 = vld [vmem:[%s6312_s6 + $0xf8] sm:$0xf0]  ;;  %v3605_v49 = vld [vmem:[%s6312_s6 + $0xc8] sm:$0xf] }
 0x34c   : > { %2640 = vmatpush.bf16.msra.mxu0 %v3586_v24  ;;  %v3626_v43 = vor.u32 %v3928_v11, %v3623_v44  ;;  %v3926_v3 = vld [vmem:[%s6312_s6 + $0xd4] sm:$0xf0]  ;;  %v3924_v51 = vld [vmem:[%s6312_s6 + $0xcc] sm:$0xf]  ;;  %v3589_v4 = vld [vmem:[%s6312_s6 + $0xa8] sm:$0xf] }
 0x34d   : > { %2602 = vmatpush.bf16.msra.mxu2 %v3550_v27  ;;  %v3606_v27 = vor.u32 %v3926_v3, %v3605_v49  ;;  %v3960_v30 = vld [vmem:[%s6312_s6 + $0x1ec] sm:$0xf]  ;;  %v3922_v0 = vld [vmem:[%s6312_s6 + $0xb4] sm:$0xf0]  ;;  %v3573_v61 = vld [vmem:[%s6312_s6 + $0x88] sm:$0xf] }
 0x34e   : > { %2659 = vmatpush.bf16.msra.mxu1 %v3730_v48  ;;  %2622 = vmatpush.bf16.msra.mxu3 %v3678_v15  ;;  %v3503_v48 = vld [vmem:[%s6312_s6 + $0x10] sm:$0xf0]  ;;  %v3591_v15 = vld [vmem:[%s6312_s6 + $0xb8] sm:$0xf0]  ;;  %v3590_v36 = vor.u32 %v3922_v0, %v3589_v4  ;;  %v3958_v26 = vld [vmem:[%s6312_s6 + $0x1d4] sm:$0xf0] }
 0x34f   : > { %v3506_v24 = vor.u32 %v3899_v45, %v3503_v48  ;;  %v3956_v8 = vld [vmem:[%s6312_s6 + $0x1cc] sm:$0xf]  ;;  %v3575_v25 = vld [vmem:[%s6312_s6 + $0x98] sm:$0xf0]  ;;  %v3717_v52 = vld [vmem:[%s6312_s6 + $0x1a8] sm:$0xf] }
 0x350   : > { %2641 = vmatpush.bf16.msra.mxu0 %v3570_v28  ;;  %v3622_v28 = vor.u32 %v3930_v46, %v3621_v57  ;;  %v3916_v5 = vld [vmem:[%s6312_s6 + $0x8c] sm:$0xf]  ;;  %v3954_v45 = vld [vmem:[%s6312_s6 + $0x1b4] sm:$0xf0]  ;;  %v3719_v21 = vld [vmem:[%s6312_s6 + $0x1b8] sm:$0xf0] }
 0x351   : > { %2603 = vmatpush.bf16.msra.mxu2 %v3534_v13  ;;  %v3751_v13 = vld [vmem:[%s6312_s6 + $0x1f8] sm:$0xf0]  ;;  %v3718_v48 = vor.u32 %v3954_v45, %v3717_v52  ;;  %v3952_v16 = vld [vmem:[%s6312_s6 + $0x1ac] sm:$0xf]  ;;  %v3914_v63 = vld [vmem:[%s6312_s6 + $0x74] sm:$0xf0] }
 0x352   : > { %2660 = vmatpush.bf16.msra.mxu1 %v3714_v22  ;;  %2623 = vmatpush.bf16.msra.mxu3 %v3662_v18  ;;  %v3754_v59 = vor.u32 %v3960_v30, %v3751_v13  ;;  %v3918_v18 = vld [vmem:[%s6312_s6 + $0x94] sm:$0xf0]  ;;  %v3912_v60 = vld [vmem:[%s6312_s6 + $0x6c] sm:$0xf]  ;;  %v3541_v44 = vld [vmem:[%s6312_s6 + $0x48] sm:$0xf] }
 0x353   : > { %3494 = vmatmul.msk.bf16.gmra.mxu0 %vm6391_vm11, %v4094_v32  ;;  %v3948_v57 = vld [vmem:[%s6312_s6 + $0x18c] sm:$0xf]  ;;  %v3525_v13 = vld [vmem:[%s6312_s6 + $0x28] sm:$0xf]  ;;  %v3906_v4 = vld [vmem:[%s6312_s6 + $0x34] sm:$0xf0] }
 0x354   : > { %2642 = vmatpush.bf16.msra.mxu0 %v3554_v31  ;;  %v3749_v31 = vld [vmem:[%s6312_s6 + $0x1e8] sm:$0xf]  ;;  %v3908_v3 = vld [vmem:[%s6312_s6 + $0x4c] sm:$0xf]  ;;  %v3526_v0 = vor.u32 %v3906_v4, %v3525_v13 }
 0x355   : > { %2604 = vmatpush.bf16.msra.mxu2 %v3518_v7  ;;  %v3735_v7 = vld [vmem:[%s6312_s6 + $0x1d8] sm:$0xf0]  ;;  %v3936_v45 = vld [vmem:[%s6312_s6 + $0x12c] sm:$0xf] }
 0x356   : > { %2661 = vmatpush.bf16.msra.mxu1 %v3698_v50  ;;  %2624 = vmatpush.bf16.msra.mxu3 %v3646_v19  ;;  %v3607_v50 = vld [vmem:[%s6312_s6 + $0xd8] sm:$0xf0]  ;;  %v3738_v37 = vor.u32 %v3956_v8, %v3735_v7  ;;  %v3722_v19 = vor.u32 %v3952_v16, %v3719_v21  ;;  %v3902_v7 = vld [vmem:[%s6312_s6 + $0x14] sm:$0xf0]  ;;  %v3637_v21 = vld [vmem:[%s6312_s6 + $0x108] sm:$0xf] }
 0x357   : > { %v3610_v47 = vor.u32 %v3924_v51, %v3607_v50  ;;  %v3543_v51 = vld [vmem:[%s6312_s6 + $0x58] sm:$0xf0] }
 0x358   : > { %2643 = vmatpush.bf16.msra.mxu0 %v3538_v56  ;;  %v3920_v56 = vld [vmem:[%s6312_s6 + $0xac] sm:$0xf]  ;;  %v3546_v50 = vor.u32 %v3908_v3, %v3543_v51 }
 0x359   : > { %3497 = vmatmul.msk.bf16.gmra.mxu1 %vm6392_vm12, %v4094_v32  ;;  %2605 = vmatpush.bf16.msra.mxu2 %v3502_v55  ;;  %v3931_v32 = vld [vmem:[%s6312_s6 + $0x104] sm:$0xf]  ;;  %v3594_v53 = vor.u32 %v3920_v56, %v3591_v15  ;;  %v3578_v55 = vor.u32 %v3916_v5, %v3575_v25  ;;  %v3527_v56 = vld [vmem:[%s6312_s6 + $0x38] sm:$0xf0]  ;;  %v3669_v15 = vld [vmem:[%s6312_s6 + $0x148] sm:$0xf] }
 0x35a   : > { %2662 = vmatpush.bf16.msra.mxu1 %v3682_v29  ;;  %v3634_v22 = vor.u32 %v3931_v32, %v3631_v41  ;;  %2625 = vmatpush.bf16.msra.mxu3 %v3630_v40  ;;  %v3733_v29 = vld [vmem:[%s6312_s6 + $0x1c8] sm:$0xf] }
 0x35b   : > { %v3734_v17 = vor.u32 %v3958_v26, %v3733_v29  ;;  %v3701_v41 = vld [vmem:[%s6312_s6 + $0x188] sm:$0xf] }
 0x35c   : > { %2644 = vmatpush.bf16.msra.mxu0 %v3522_v1  ;;  %v3509_v29 = vld [vmem:[%s6312_s6 + $0x8] sm:$0xf] }
 0x35d   : > { %2678 = vmatpush.bf16.msrb.mxu2 %v3622_v28  ;;  %v3703_v28 = vld [vmem:[%s6312_s6 + $0x198] sm:$0xf0]  ;;  %v3510_v25 = vor.u32 %v3902_v7, %v3509_v29 }
 0x35e   : > { %2663 = vmatpush.bf16.msra.mxu1 %v3666_v38  ;;  %v3574_v38 = vor.u32 %v3918_v18, %v3573_v61  ;;  %v3653_v61 = vld [vmem:[%s6312_s6 + $0x128] sm:$0xf]  ;;  %v3938_v18 = vld [vmem:[%s6312_s6 + $0x134] sm:$0xf0] }
 0x35f   : > { %v3654_v16 = vor.u32 %v3938_v18, %v3653_v61 }
 0x360   : > { %2645 = vmatpush.bf16.msra.mxu0 %v3506_v24  ;;  %v3557_v24 = vld [vmem:[%s6312_s6 + $0x68] sm:$0xf] }
 0x361   : > { %2679 = vmatpush.bf16.msrb.mxu2 %v3606_v27  ;;  %v3558_v12 = vor.u32 %v3914_v63, %v3557_v24  ;;  %v3685_v27 = vld [vmem:[%s6312_s6 + $0x168] sm:$0xf]  ;;  %v3934_v24 = vld [vmem:[%s6312_s6 + $0x114] sm:$0xf0]  ;;  %v3932_v63 = vld [vmem:[%s6312_s6 + $0x10c] sm:$0xf] }
 0x362   : > { %2664 = vmatpush.bf16.msra.mxu1 %v3650_v62  ;;  %v3559_v62 = vld [vmem:[%s6312_s6 + $0x78] sm:$0xf0] }
 0x363   : > { %3495 = vmatmul.msk.bf16.gmra.mxu0 %vm6393_vm14, %v4095_v42  ;;  %v3562_v32 = vor.u32 %v3912_v60, %v3559_v62  ;;  %v3639_v60 = vld [vmem:[%s6312_s6 + $0x118] sm:$0xf0] }
 0x364   : > { %2718 = vmatpush.bf16.msrb.mxu0 %v3626_v43  ;;  %v3910_v43 = vld [vmem:[%s6312_s6 + $0x54] sm:$0xf0] }
 0x365   : > { %2680 = vmatpush.bf16.msrb.mxu2 %v3590_v36  ;;  %v3542_v49 = vor.u32 %v3910_v43, %v3541_v44  ;;  %v3942_v36 = vld [vmem:[%s6312_s6 + $0x154] sm:$0xf0] }
 0x366   : > { %2665 = vmatpush.bf16.msra.mxu1 %v3634_v22  ;;  %v3950_v22 = vld [vmem:[%s6312_s6 + $0x194] sm:$0xf0] }
 0x367   : > { %v3702_v11 = vor.u32 %v3950_v22, %v3701_v41  ;;  %v3642_v41 = vor.u32 %v3932_v63, %v3639_v60 }
 0x368   : > { %2719 = vmatpush.bf16.msrb.mxu0 %v3610_v47  ;;  %v3687_v47 = vld [vmem:[%s6312_s6 + $0x178] sm:$0xf0] }
 0x369   : > { %3498 = vmatmul.msk.bf16.gmra.mxu1 %vm6394_vm9, %v4095_v42  ;;  %v3962_v42 = vld [vmem:[%s6312_s6 + $0x1f4] sm:$0xf0]  ;;  %2681 = vmatpush.bf16.msrb.mxu2 %v3574_v38 }
 0x36a   : > { %v3750_v6 = vor.u32 %v3962_v42, %v3749_v31  ;;  %2738 = vmatpush.bf16.msrb.mxu1 %v3754_v59  ;;  %v3946_v31 = vld [vmem:[%s6312_s6 + $0x174] sm:$0xf0]  ;;  %v3944_v42 = vld [vmem:[%s6312_s6 + $0x16c] sm:$0xf] }
 0x36b   : > { %v3690_v30 = vor.u32 %v3944_v42, %v3687_v47  ;;  %v3904_v59 = vld [vmem:[%s6312_s6 + $0x2c] sm:$0xf] }
 0x36c   : > { %2698 = vmatpush.bf16.msrb.mxu3 %v3750_v6  ;;  %2720 = vmatpush.bf16.msrb.mxu0 %v3594_v53  ;;  %v3686_v6 = vor.u32 %v3946_v31, %v3685_v27  ;;  %v3940_v53 = vld [vmem:[%s6312_s6 + $0x14c] sm:$0xf]  ;;  %v3530_v8 = vor.u32 %v3904_v59, %v3527_v56 }
 0x36d   : > { %2682 = vmatpush.bf16.msrb.mxu2 %v3558_v12  ;;  %v3638_v12 = vor.u32 %v3934_v24, %v3637_v21 }
 0x36e   : > { %2739 = vmatpush.bf16.msrb.mxu1 %v3738_v37  ;;  %v3511_v37 = vld [vmem:[%s6312_s6 + $0x18] sm:$0xf0] }
 0x370   : > { %2699 = vmatpush.bf16.msrb.mxu3 %v3734_v17  ;;  %2721 = vmatpush.bf16.msrb.mxu0 %v3578_v55  ;;  %v3670_v17 = vor.u32 %v3942_v36, %v3669_v15  ;;  %v3655_v55 = vld [vmem:[%s6312_s6 + $0x138] sm:$0xf0] }
 0x371   : > { %2683 = vmatpush.bf16.msrb.mxu2 %v3542_v49 }
 0x372   : > { %2740 = vmatpush.bf16.msrb.mxu1 %v3722_v19  ;;  %v3658_v19 = vor.u32 %v3936_v45, %v3655_v55 }
 0x374   : > { %2700 = vmatpush.bf16.msrb.mxu3 %v3718_v48  ;;  %2722 = vmatpush.bf16.msrb.mxu0 %v3562_v32 }
 0x375   : > { %2684 = vmatpush.bf16.msrb.mxu2 %v3526_v0 }
 0x378   : > { %2701 = vmatpush.bf16.msrb.mxu3 %v3702_v11  ;;  %2723 = vmatpush.bf16.msrb.mxu0 %v3546_v50 }
 0x379   : > { %2685 = vmatpush.bf16.msrb.mxu2 %v3510_v25 }
 0x37c   : > { %2702 = vmatpush.bf16.msrb.mxu3 %v3686_v6  ;;  %2724 = vmatpush.bf16.msrb.mxu0 %v3530_v8 }
 0x380   : > { %2703 = vmatpush.bf16.msrb.mxu3 %v3670_v17 }
 0x384   : > { %2704 = vmatpush.bf16.msrb.mxu3 %v3654_v16 }
 0x388   : > { %2705 = vmatpush.bf16.msrb.mxu3 %v3638_v12 }
 0x3c0   : > { %v2224_v39 = vpop.f32.mrf.mxu0 }
 0x3c6   : > { %v2248_v33 = vpop.f32.mrf.mxu1 }
 0x3c8   : > { %v2226_v1 = vpop.f32.mrf.mxu0 }
 0x3c9   : > { %v6119_v20 = vpack.c.bf16 %v2226_v1, %v2224_v39  ;;  %v3706_v39 = vor.u32 %v3948_v57, %v3703_v28  ;;  %v3900_v1 = vld [vmem:[%s6312_s6 + $0xc] sm:$0xf] }
 0x3ca   : > { %v3514_v48 = vor.u32 %v3900_v1, %v3511_v37 }
 0x3cb   : > { %2606 = vmatmul.bf16.vlgmr.msra.gmra.mxu2 %v6119_v20  ;;  %2646 = vmatmul.bf16.vlgmr.msra.gmra.mxu0 %v6119_v20 }
 0x3cc   : > { %2741 = vmatpush.bf16.msrb.mxu1 %v3706_v39  ;;  %2725 = vmatpush.bf16.msrb.mxu0 %v3514_v48 }
 0x3ce   : > { %v2250_v9 = vpop.f32.mrf.mxu1 }
 0x3cf   : > { %v6159_v40 = vpack.c.bf16 %v2250_v9, %v2248_v33  ;;  %v3671_v33 = vld [vmem:[%s6312_s6 + $0x158] sm:$0xf0] }
 0x3d0   : > { %v2229_v46 = vpop.f32.mrf.mxu0  ;;  %2742 = vmatpush.bf16.msrb.mxu1 %v3690_v30  ;;  %v3674_v38 = vor.u32 %v3940_v53, %v3671_v33 }
 0x3d1   : > { %2626 = vmatmul.bf16.vlgmr.msra.gmra.mxu3 %v6159_v40  ;;  %2666 = vmatmul.bf16.vlgmr.msra.gmra.mxu1 %v6159_v40 }
 0x3d4   : > { %2743 = vmatpush.bf16.msrb.mxu1 %v3674_v38 }
 0x3d6   : > { %v2253_v26 = vpop.f32.mrf.mxu1 }
 0x3d8   : > { %v2231_v5 = vpop.f32.mrf.mxu0  ;;  %2744 = vmatpush.bf16.msrb.mxu1 %v3658_v19 }
 0x3d9   : > { %v2265_v52 = vpack.c.bf16 %v2231_v5, %v2229_v46 }
 0x3db   : > { %2609 = vmatmul.bf16.gmra.mxu2 %v2265_v52  ;;  %2649 = vmatmul.bf16.gmra.mxu0 %v2265_v52 }
 0x3dc   : > { %2745 = vmatpush.bf16.msrb.mxu1 %v3642_v41 }
 0x3de   : > { %v2255_v62 = vpop.f32.mrf.mxu1 }
 0x3df   : > { %v2266_v9 = vpack.c.bf16 %v2255_v62, %v2253_v26 }
 0x3e0   : > { %v2234_v32 = vpop.f32.mrf.mxu0 }
 0x3e1   : > { %2629 = vmatmul.bf16.gmra.mxu3 %v2266_v9  ;;  %2669 = vmatmul.bf16.gmra.mxu1 %v2266_v9 }
 0x3e6   : > { %v2258_v22 = vpop.f32.mrf.mxu1 }
 0x3e8   : > { %v2236_v57 = vpop.f32.mrf.mxu0 }
 0x3e9   : > { %v2267_v46 = vpack.c.bf16 %v2236_v57, %v2234_v32 }
 0x3eb   : > { %2614 = vmatmul.bf16.gmra.mxu2 %v2267_v46  ;;  %2654 = vmatmul.bf16.gmra.mxu0 %v2267_v46 }
 0x3ee   : > { %v2260_v11 = vpop.f32.mrf.mxu1 }
 0x3ef   : > { %v2268_v28 = vpack.c.bf16 %v2260_v11, %v2258_v22 }
 0x3f1   : > { %2634 = vmatmul.bf16.gmra.mxu3 %v2268_v28  ;;  %2674 = vmatmul.bf16.gmra.mxu1 %v2268_v28 }
 0x3fb   : > { %2686 = vmatmul.bf16.vlgmr.msrb.gmra.mxu2 %v6119_v20  ;;  %2726 = vmatmul.bf16.vlgmr.msrb.gmra.mxu0 %v6119_v20  ;;  %v2214_v20 = vld [vmem:[%s6313_s7] sm:$0xf] }
 0x3fc   : > { %v2271_v50 = vperm.slane %v2214_v20, 1  ;;  %v2270_v30 = vperm.slane %v2214_v20, 0  ;;  %v2273_v19 = vperm.slane %v2214_v20, 3 }
 0x401   : > { %2706 = vmatmul.bf16.vlgmr.msrb.gmra.mxu3 %v6159_v40  ;;  %2746 = vmatmul.bf16.vlgmr.msrb.gmra.mxu1 %v6159_v40 }
 0x40b   : > { %2689 = vmatmul.bf16.gmra.mxu2 %v2265_v52  ;;  %2729 = vmatmul.bf16.gmra.mxu0 %v2265_v52 }
 0x411   : > { %2709 = vmatmul.bf16.gmra.mxu3 %v2266_v9  ;;  %2749 = vmatmul.bf16.gmra.mxu1 %v2266_v9  ;;  %v2272_v9 = vperm.slane %v2214_v20, 2 }
 0x41b   : > { %2694 = vmatmul.bf16.gmra.mxu2 %v2267_v46  ;;  %2734 = vmatmul.bf16.gmra.mxu0 %v2267_v46 }
 0x421   : > { %2714 = vmatmul.bf16.gmra.mxu3 %v2268_v28  ;;  %2754 = vmatmul.bf16.gmra.mxu1 %v2268_v28 }
 0x448   : > { %v2647_v44 = vpop.f32.mrf.mxu0 }
 0x44e   : > { %v2607_v43 = vpop.f32.mrf.mxu2  ;;  %v2667_v39 = vpop.f32.mrf.mxu1 }
 0x450   : > { %v2648_v49 = vpop.f32.mrf.mxu0 }
 0x454   : > { %v2627_v3 = vpop.f32.mrf.mxu3 }
 0x456   : > { %v2608_v51 = vpop.f32.mrf.mxu2  ;;  %v2668_v27 = vpop.f32.mrf.mxu1 }
 0x458   : > { %v2650_v40 = vpop.f32.mrf.mxu0 }
 0x459   : > { %v2651_v42 = vadd.f32 %v2650_v40, %v2271_v50 }
 0x45c   : > { %v2628_v31 = vpop.f32.mrf.mxu3 }
 0x45e   : > { %v2610_v47 = vpop.f32.mrf.mxu2  ;;  %v2670_v6 = vpop.f32.mrf.mxu1 }
 0x45f   : > { %v6266_v13 = vadd.f32 %v2670_v6, %v2651_v42  ;;  %v2611_v59 = vadd.f32 %v2610_v47, %v2270_v30 }
 0x460   : > { %v2652_v4 = vpop.f32.mrf.mxu0 }
 0x461   : > { %v2653_v56 = vadd.f32 %v2652_v4, %v2271_v50 }
 0x464   : > { %v2630_v0 = vpop.f32.mrf.mxu3 }
 0x465   : > { %v6268_v15 = vadd.f32 %v2630_v0, %v2611_v59 }
 0x466   : > { %v2612_v36 = vpop.f32.mrf.mxu2  ;;  %v2672_v53 = vpop.f32.mrf.mxu1 }
 0x467   : > { %v6270_v33 = vadd.f32 %v2672_v53, %v2653_v56  ;;  %v2613_v26 = vadd.f32 %v2612_v36, %v2270_v30 }
 0x468   : > { %v2655_v29 = vpop.f32.mrf.mxu0 }
 0x46c   : > { %v2632_v8 = vpop.f32.mrf.mxu3 }
 0x46d   : > { %v6272_v17 = vadd.f32 %v2632_v8, %v2613_v26 }
 0x46e   : > { %v2615_v7 = vpop.f32.mrf.mxu2  ;;  %v2675_v1 = vpop.f32.mrf.mxu1 }
 0x470   : > { %v2656_v37 = vpop.f32.mrf.mxu0 }
 0x474   : > { %v2635_v61 = vpop.f32.mrf.mxu3 }
 0x476   : > { %v2616_v18 = vpop.f32.mrf.mxu2  ;;  %v2676_v5 = vpop.f32.mrf.mxu1 }
 0x478   : > { %v2727_v38 = vpop.f32.mrf.mxu0 }
 0x47c   : > { %v2636_v25 = vpop.f32.mrf.mxu3 }
 0x47e   : > { %v2687_v52 = vpop.f32.mrf.mxu2  ;;  %v2747_v45 = vpop.f32.mrf.mxu1 }
 0x480   : > { %v2728_v55 = vpop.f32.mrf.mxu0 }
 0x484   : > { %v2707_v48 = vpop.f32.mrf.mxu3 }
 0x486   : > { %v2688_v16 = vpop.f32.mrf.mxu2  ;;  %v2748_v21 = vpop.f32.mrf.mxu1 }
 0x487   : > { %v2141_v21 = vmax.f32 %v4950_v2, %v5809_v35 }
 0x488   : > { %v2730_v24 = vpop.f32.mrf.mxu0 }
 0x489   : > { %v2731_v60 = vadd.f32 %v2730_v24, %v2273_v19 }
 0x48c   : > { %v2708_v63 = vpop.f32.mrf.mxu3 }
 0x48e   : > { %v2690_v62 = vpop.f32.mrf.mxu2  ;;  %v2750_v12 = vpop.f32.mrf.mxu1 }
 0x48f   : > { %v2751_v32 = vadd.f32 %v2750_v12, %v2731_v60  ;;  %v2691_v57 = vadd.f32 %v2690_v62, %v2272_v9 }
 0x490   : > { %v2732_v22 = vpop.f32.mrf.mxu0 }
 0x491   : > { %v3756_v41 = vmul.f32 -1.442695, %v2751_v32  ;;  %v2733_v28 = vadd.f32 %v2732_v22, %v2273_v19 }
 0x493   : > { %4074 = vpow2.f32 %v3756_v41 }
 0x494   : > { %v2710_v46 = vpop.f32.mrf.mxu3 }
 0x495   : > { %v2711_v11 = vadd.f32 %v2710_v46, %v2691_v57 }
 0x496   : > { %v2692_v43 = vpop.f32.mrf.mxu2  ;;  %v2752_v39 = vpop.f32.mrf.mxu1 }
 0x497   : > { %v3755_v44 = vmul.f32 -1.442695, %v2711_v11  ;;  %v2753_v49 = vadd.f32 %v2752_v39, %v2733_v28  ;;  %v2693_v50 = vadd.f32 %v2692_v43, %v2272_v9 }
 0x498   : > { %v2735_v51 = vpop.f32.mrf.mxu0 }
 0x499   : > { %v4075_v3 = vpop.eup %4074  ;;  %4076 = vpow2.f32 %v3755_v44  ;;  %v3758_v40 = vmul.f32 -1.442695, %v2753_v49  ;;  %v2140_v44 = vmax.f32 %v5001_v14, %v5831_v23  ;;  %v2143_v23 = vmax.f32 %v4933_v54, %v5812_v34 }
 0x49a   : > { %v2771_v27 = vadd.f32 1.0, %v4075_v3 }
 0x49c   : > { %4078 = vrcp.f32 %v2771_v27  ;;  %v2712_v20 = vpop.f32.mrf.mxu3  ;;  %v2800_v8 = vand.u32 2147483648, %v2771_v27  ;;  %v2798_v37 = vand.u32 2147483647, %v2771_v27  ;;  %vm2794_vm6 = vweird.f32 %v2771_v27 }
 0x49d   : > { %4080 = vpow2.f32 %v3758_v40  ;;  %v2713_v31 = vadd.f32 %v2712_v20, %v2693_v50 }
 0x49e   : > { %v2695_v6 = vpop.f32.mrf.mxu2  ;;  %v2755_v30 = vpop.f32.mrf.mxu1  ;;  %v2801_v45 = vor.u32 1.1754944e-38, %v2800_v8  ;;  %vm2799_vm5 = vcmp.eq.f32.partialorder %v2798_v37, 8.507059e+37 }
 0x49f   : > { %v4077_v42 = vpop.eup %4076  ;;  %v3757_v47 = vmul.f32 -1.442695, %v2713_v31 }
 0x4a0   : > { %v2770_v4 = vadd.f32 1.0, %v4077_v42  ;;  %v2736_v59 = vpop.f32.mrf.mxu0 }
 0x4a1   : > { %4082 = vpow2.f32 %v3757_v47  ;;  %v2142_v59 = vmax.f32 %v4990_v58, %v5710_v10 }
 0x4a2   : > { %v4079_v0 = vpop.eup %4078  ;;  %4084 = vrcp.f32 %v2770_v4  ;;  %v2783_v19 = vand.u32 2147483647, %v2770_v4  ;;  %v2785_v63 = vand.u32 2147483648, %v2770_v4  ;;  %vm2779_vm8 = vweird.f32 %v2770_v4 }
 0x4a3   : > { %v4081_v56 = vpop.eup %4080  ;;  %v2790_v36 = vmul.f32 %v4079_v0, %v2771_v27  ;;  %vm2795_vm4 = vweird.f32 %v4079_v0 }
 0x4a4   : > { %v2773_v53 = vadd.f32 1.0, %v4081_v56  ;;  %v2715_v29 = vpop.f32.mrf.mxu3  ;;  %vm2796_vm15 = vmor %vm2794_vm6, %vm2795_vm4  ;;  %vm2784_vm7 = vcmp.eq.f32.partialorder %v2783_v19, 8.507059e+37  ;;  %v2786_v35 = vor.u32 1.1754944e-38, %v2785_v63 }
 0x4a5   : > { %v2791_v26 = vsub.f32 1.0, %v2790_v36 }
 0x4a6   : > { %4086 = vrcp.f32 %v2773_v53  ;;  %v2696_v61 = vpop.f32.mrf.mxu2  ;;  %v2756_v18 = vpop.f32.mrf.mxu1  ;;  %v2828_v57 = vand.u32 2147483647, %v2773_v53  ;;  %v2830_v46 = vand.u32 2147483648, %v2773_v53  ;;  %vm2824_vm2 = vweird.f32 %v2773_v53 }
 0x4a7   : > { %v4083_v7 = vpop.eup %4082  ;;  %v2792_v1 = vmul.f32 %v4079_v0, %v2791_v26 }
 0x4a8   : > { %v4085_v5 = vpop.eup %4084  ;;  %v6274_v38 = vadd.f32 1.0, %v4083_v7  ;;  %vm2829_vm10 = vcmp.eq.f32.partialorder %v2828_v57, 8.507059e+37  ;;  %v2831_v51 = vor.u32 1.1754944e-38, %v2830_v46 }
 0x4a9   : > { %v2793_v25 = vadd.f32 %v4079_v0, %v2792_v1  ;;  %v2775_v52 = vmul.f32 %v4085_v5, %v2770_v4  ;;  %vm2780_vm13 = vweird.f32 %v4085_v5 }
 0x4aa   : > { %4088 = vrcp.f32 %v6274_v38  ;;  %vm2781_vm1 = vmor %vm2779_vm8, %vm2780_vm13  ;;  %v2813_v27 = vand.u32 2147483647, %v6274_v38  ;;  %v2815_v40 = vand.u32 2147483648, %v6274_v38  ;;  %vm2809_vm12 = vweird.f32 %v6274_v38 }
 0x4ab   : > { %v2797_v55 = vsel %vm2796_vm15, %v4079_v0, %v2793_v25  ;;  %v2776_v48 = vsub.f32 1.0, %v2775_v52 }
 0x4ac   : > { %v4087_v16 = vpop.eup %4086  ;;  %v2802_v24 = vsel %vm2799_vm5, %v2801_v45, %v2797_v55  ;;  %v2716_v60 = vpop.f32.mrf.mxu3  ;;  %v2816_v47 = vor.u32 1.1754944e-38, %v2815_v40  ;;  %vm2814_vm9 = vcmp.eq.f32.partialorder %v2813_v27, 8.507059e+37 }
 0x4ad   : > { %v2835_v62 = vmul.f32 %v2802_v24, %v6266_v13  ;;  %v2777_v12 = vmul.f32 %v4085_v5, %v2776_v48  ;;  %v2820_v9 = vmul.f32 %v4087_v16, %v2773_v53  ;;  %vm2825_vm3 = vweird.f32 %v4087_v16 }
 0x4ae   : > { %vm2826_vm0 = vmor %vm2824_vm2, %vm2825_vm3 }
 0x4af   : > { %v2839_v32 = vmax.f32 %v2141_v21, %v2835_v62  ;;  %v2778_v41 = vadd.f32 %v4085_v5, %v2777_v12  ;;  %v2821_v22 = vsub.f32 1.0, %v2820_v9 }
 0x4b0   : > { %v4089_v2 = vpop.eup %4088 }
 0x4b1   : > { %2843 = vst [vmem:[%s6284_s28 + $0x8] sm:$0xff] %v2839_v32  ;;  %v2782_v13 = vsel %vm2781_vm1, %v4085_v5, %v2778_v41  ;;  %v2822_v11 = vmul.f32 %v4087_v16, %v2821_v22  ;;  %v2805_v28 = vmul.f32 %v4089_v2, %v6274_v38  ;;  %vm2810_vm11 = vweird.f32 %v4089_v2 }
 0x4b2   : > { %v2787_v43 = vsel %vm2784_vm7, %v2786_v35, %v2782_v13  ;;  %vm2811_vm14 = vmor %vm2809_vm12, %vm2810_vm11 }
 0x4b3   : > { %v2834_v39 = vmul.f32 %v2787_v43, %v6268_v15  ;;  %v2823_v49 = vadd.f32 %v4087_v16, %v2822_v11  ;;  %v2806_v3 = vsub.f32 1.0, %v2805_v28 }
 0x4b5   : > { %v2838_v50 = vmax.f32 %v2140_v44, %v2834_v39  ;;  %v2827_v20 = vsel %vm2826_vm0, %v4087_v16, %v2823_v49  ;;  %v2807_v31 = vmul.f32 %v4089_v2, %v2806_v3 }
 0x4b6   : > { %v2832_v14 = vsel %vm2829_vm10, %v2831_v51, %v2827_v20 }
 0x4b7   : > { %2842 = vst [vmem:[%s6284_s28] sm:$0xff] %v2838_v50  ;;  %v2837_v15 = vmul.f32 %v2832_v14, %v6270_v33  ;;  %v2808_v42 = vadd.f32 %v4089_v2, %v2807_v31 }
 0x4b9   : > { %v2841_v6 = vmax.f32 %v2143_v23, %v2837_v15  ;;  %v2812_v30 = vsel %vm2811_vm14, %v4089_v2, %v2808_v42 }
 0x4ba   : > { %v2817_v4 = vsel %vm2814_vm9, %v2816_v47, %v2812_v30 }
 0x4bb   : > { %2845 = vst [vmem:[%s6284_s28 + $0x18] sm:$0xff] %v2841_v6  ;;  %v2836_v0 = vmul.f32 %v2817_v4, %v6272_v17 }
 0x4bd   : > { %v2840_v56 = vmax.f32 %v2142_v59, %v2836_v0 }
 0x4bf   : > { %2844 = vst [vmem:[%s6284_s28 + $0x10] sm:$0xff] %v2840_v56 }
 0x4c0 PF: > { %s18_s27 = sadd.s32 1, %s4102_s27  }
 0x4c1   : > { %p15_p4 = scmp.ge.s32.totalorder %s18_s27, 4  }
 0x4c3   :  { %17 = sbr.rel (!%p15_p4) target bundleno = 1 (0x1), region = 82 }

</bundles_post_ra>
